<compile_context>
chip_gen: v5e
topology: v5e:2x2
jax: 0.10.0
libtpu: 0.0.40
codegen_flags: <defaults>
</compile_context>

<pallas_src>
import math

import jax
import jax.numpy as jnp
from jax.experimental import pallas as pl
from jax.experimental.pallas import tpu as pltpu

K = 7          # conv kernel size
PAD = 3        # "same" padding


def _pick_batch_block(B):
    """Several batch elements per grid step when B is large (amortize step cost),
    but keep >= 2 grid steps when possible so both v7x TensorCores get work."""
    for bb in (8, 4, 2):
        if B % bb == 0 and B // bb >= 2:
            return bb
    return 1


def _make_kernel(BB, C, H, W, TOP, BOT):
    HW = H * W
    L = (TOP + H + BOT) * W

    def kernel(x_ref, w_ref, mask_ref, out_ref, xrp_ref, m_ref):
        # x_ref    (BB, C, HW)       VMEM  lane-dense input block
        # w_ref    (K*K, C)   f32    VMEM  tap-major conv weight (resident)
        # mask_ref (K, HW)    f32    VMEM  per-kw column-validity masks (resident)
        # out_ref  (BB, C, HW)       VMEM  lane-dense output block
        # xrp_ref  (C, L)     f32    VMEM  row-padded flat image scratch
        # m_ref    (K*K, L)   f32    VMEM  per-tap channel-contracted maps (MXU out)

        # Zero only the tiny top/bottom halo strips (not the whole padded volume).
        # Done every grid step (cheap) because with "parallel" dimension semantics
        # iteration order / core assignment is not guaranteed.
        xrp_ref[:, :TOP * W] = jnp.zeros((C, TOP * W), jnp.float32)
        xrp_ref[:, (TOP + H) * W:] = jnp.zeros((C, BOT * W), jnp.float32)

        for bb in range(BB):
            # Interior copy: one lane-dense store; TOP*W is a multiple of 128 when
            # cheaply possible so it does not straddle lane tiles.
            xrp_ref[:, TOP * W:(TOP + H) * W] = x_ref[bb].astype(jnp.float32)

            # Channel contraction on the MXU: (K*K, C) @ (C, L) -> (K*K, L).
            m_ref[...] = jnp.dot(w_ref[...], xrp_ref[...],
                                 preferred_element_type=jnp.float32)

            # 49 shifted, column-masked adds into 4 independent accumulators (ILP).
            accs = [jnp.zeros((1, HW), jnp.float32) for _ in range(4)]
            i = 0
            for kw in range(K):
                mk = mask_ref[kw:kw + 1, :]                      # (1, HW)
                for kh in range(K):
                    tap = kh * K + kw
                    base = (TOP + kh - PAD) * W + (kw - PAD)      # always in-bounds
                    row = m_ref[tap:tap + 1, base:base + HW]      # (1, HW)
                    if kw != PAD:   # center column never crosses a row edge
                        row = row * mk
                    accs[i % 4] = accs[i % 4] + row
                    i += 1

            attn = jax.nn.sigmoid((accs[0] + accs[1]) + (accs[2] + accs[3]))  # (1, HW)
            out_ref[bb] = (x_ref[bb].astype(jnp.float32) * attn).astype(out_ref.dtype)

    return kernel


def spatial_attention(x, weight):
    """x: (B, C, H, W); weight: (1, C, 7, 7) (PyTorch Conv2d OIHW layout, no bias)."""
    B, C, H, W = x.shape
    assert weight.shape == (1, C, K, K)
    assert W >= PAD, "W must be >= 3"
    HW = H * W

    # Tap-major weight: w2[kh*K + kw, c] = weight[0, c, kh, kw].
    w2 = jnp.transpose(weight[0].astype(jnp.float32), (1, 2, 0)).reshape(K * K, C)

    # Per-kw column-validity masks over the flattened pixel axis (left/right padding).
    col = jnp.arange(HW, dtype=jnp.int32) % W
    kws = jnp.arange(K, dtype=jnp.int32)[:, None]
    col_mask = ((col[None, :] + kws - PAD >= 0)
                & (col[None, :] + kws - PAD < W)).astype(jnp.float32)      # (K, HW)

    # Row padding: TOP/BOT zero rows so every shifted flat read stays in bounds;
    # bump TOP so the interior starts on a 128-lane boundary when cheap.
    base_pad = PAD + (PAD + W - 1) // W          # = 4 for W >= 3
    TOP = base_pad
    for t in range(base_pad, base_pad + 16):
        if (t * W) % 128 == 0:
            TOP = t
            break
    BOT = base_pad
    L = (TOP + H + BOT) * W

    BB = _pick_batch_block(B)
    grid = (B // BB,)

    # Lane-dense I/O: free contiguous reshape, last dim H*W instead of W.
    x_flat = x.reshape(B, C, HW)

    # VMEM budget: double-buffered in/out blocks + resident weight/mask + scratch,
    # clamped to ~75% of the physical per-core VMEM (safe on v7x's 64 MiB).
    blk = BB * C * HW * x.dtype.itemsize
    scratch_bytes = (C * L + K * K * L) * 4
    resident = (K * K * C + K * HW) * 4
    needed = 4 * blk + 4 * resident + scratch_bytes + (4 << 20)
    try:
        cap = int(getattr(pltpu.get_tpu_info(), "vmem_capacity_bytes", 64 << 20))
    except Exception:
        cap = 64 << 20
    vmem_limit = int(min((cap * 3) // 4, max(needed, 16 << 20)))

    kernel = _make_kernel(BB, C, H, W, TOP, BOT)

    out_flat = pl.pallas_call(
        kernel,
        out_shape=jax.ShapeDtypeStruct((B, C, HW), x.dtype),
        grid_spec=pltpu.PrefetchScalarGridSpec(
            num_scalar_prefetch=0,
            grid=grid,
            in_specs=[
                pl.BlockSpec((BB, C, HW), lambda b: (b, 0, 0)),
                pl.BlockSpec((K * K, C), lambda b: (0, 0)),
                pl.BlockSpec((K, HW), lambda b: (0, 0)),
            ],
            out_specs=pl.BlockSpec((BB, C, HW), lambda b: (b, 0, 0)),
            scratch_shapes=[
                pltpu.VMEM((C, L), jnp.float32),         # row-padded flat image
                pltpu.VMEM((K * K, L), jnp.float32),     # per-tap maps (MXU output)
            ],
        ),
        compiler_params=pltpu.CompilerParams(
            dimension_semantics=("parallel",),
            vmem_limit_bytes=vmem_limit,
        ),
    )(x_flat, w2, col_mask)

    return out_flat.reshape(B, C, H, W)


def spatial_attention_ref(x, weight):
    """Pure-JAX reference (matches PyTorch Conv2d + sigmoid + scale semantics)."""
    attn = jax.lax.conv_general_dilated(
        x.astype(jnp.float32), weight.astype(jnp.float32),
        window_strides=(1, 1), padding=((PAD, PAD), (PAD, PAD)),
        dimension_numbers=("NCHW", "OIHW", "NCHW"),
        precision=jax.lax.Precision.HIGHEST)
    return (x.astype(jnp.float32) * jax.nn.sigmoid(attn)).astype(x.dtype)


if __name__ == "__main__":
    B, C, H, W = 2, 4, 16, 16
    key = jax.random.PRNGKey(0)
    kx, kw_key = jax.random.split(key)

    x = jax.random.normal(kx, (B, C, H, W), dtype=jnp.float32)
    # Same shape as nn.Conv2d(C, 1, 7, padding=3, bias=False).weight
    fan_in = C * K * K
    bound = 1.0 / math.sqrt(fan_in)
    weight = jax.random.uniform(kw_key, (1, C, K, K), dtype=jnp.float32,
                                minval=-bound, maxval=bound)

    out = spatial_attention(x, weight)
    out = jax.block_until_ready(out)

    ref = spatial_attention_ref(x, weight)
    assert out.shape == (B, C, H, W)
    assert jnp.allclose(out, ref, atol=1e-3, rtol=1e-3), "mismatch vs reference"

    print("KERNEL_OK")
</pallas_src>

<mosaic_0001>
module attributes {stable_mosaic.version = 11 : i64} {
  func.func @kernel(%arg0: i32, %arg1: memref<1x4x256xf32, #tpu.memory_space<vmem>>, %arg2: memref<49x4xf32, #tpu.memory_space<vmem>>, %arg3: memref<7x256xf32, #tpu.memory_space<vmem>>, %arg4: memref<1x4x256xf32, #tpu.memory_space<vmem>>, %arg5: memref<4x448xf32, #tpu.memory_space<vmem>>, %arg6: memref<49x448xf32, #tpu.memory_space<vmem>>) attributes {dimension_semantics = [#tpu.dimension_semantics<parallel>], iteration_bounds = array<i64: 2>, scalar_prefetch = 0 : i64, scratch_operands = 2 : i64, tpu.core_type = #tpu.core_type<tc>, window_params = [{transform_indices = @transform_0, window_bounds = array<i64: 1, 4, 256>}, {pipeline_mode = #tpu.pipeline_mode<synchronous>, transform_indices = @transform_1, window_bounds = array<i64: 49, 4>}, {pipeline_mode = #tpu.pipeline_mode<synchronous>, transform_indices = @transform_2, window_bounds = array<i64: 7, 256>}, {transform_indices = @transform_3, window_bounds = array<i64: 1, 4, 256>}]} {
    %cst = arith.constant 0.000000e+00 : f32
    %0 = vector.broadcast %cst : f32 to vector<4x128xf32>
    %c0 = arith.constant 0 : index
    %c0_0 = arith.constant 0 : index
    %1 = vector.load %arg5[%c0, %c0_0] : memref<4x448xf32, #tpu.memory_space<vmem>>, vector<4x128xf32>
    tpu.vector_store %arg5[%c0, %c0_0], %0 {strides = array<i32>} : memref<4x448xf32, #tpu.memory_space<vmem>>, vector<4x128xf32>,
    %cst_1 = arith.constant 0.000000e+00 : f32
    %2 = vector.broadcast %cst_1 : f32 to vector<4x64xf32>
    %c0_2 = arith.constant 0 : index
    %c384 = arith.constant 384 : index
    %3 = vector.load %arg5[%c0_2, %c384] : memref<4x448xf32, #tpu.memory_space<vmem>>, vector<4x64xf32>
    tpu.vector_store %arg5[%c0_2, %c384], %2 {strides = array<i32>} : memref<4x448xf32, #tpu.memory_space<vmem>>, vector<4x64xf32>,
    %c0_3 = arith.constant 0 : index
    %c0_4 = arith.constant 0 : index
    %c0_5 = arith.constant 0 : index
    %4 = vector.load %arg1[%c0_3, %c0_4, %c0_5] : memref<1x4x256xf32, #tpu.memory_space<vmem>>, vector<1x4x256xf32>
    %5 = vector.shape_cast %4 : vector<1x4x256xf32> to vector<4x256xf32>
    %c0_6 = arith.constant 0 : index
    %c128 = arith.constant 128 : index
    %6 = vector.load %arg5[%c0_6, %c128] : memref<4x448xf32, #tpu.memory_space<vmem>>, vector<4x256xf32>
    tpu.vector_store %arg5[%c0_6, %c128], %5 {strides = array<i32>} : memref<4x448xf32, #tpu.memory_space<vmem>>, vector<4x256xf32>,
    %c0_7 = arith.constant 0 : index
    %c0_8 = arith.constant 0 : index
    %7 = vector.load %arg2[%c0_7, %c0_8] : memref<49x4xf32, #tpu.memory_space<vmem>>, vector<49x4xf32>
    %c0_9 = arith.constant 0 : index
    %c0_10 = arith.constant 0 : index
    %8 = vector.load %arg5[%c0_9, %c0_10] : memref<4x448xf32, #tpu.memory_space<vmem>>, vector<4x448xf32>
    %cst_11 = arith.constant dense<0.000000e+00> : vector<49x448xf32>
    %9 = tpu.matmul %7, %8, %cst_11 {dimension_numbers = #tpu.dot_dimension_numbers<[1], [0], [0], [1], [0, 0, 1, 1], [], []>} : vector<49x4xf32>, vector<4x448xf32>, vector<49x448xf32> -> vector<49x448xf32>
    %c0_12 = arith.constant 0 : index
    %c0_13 = arith.constant 0 : index
    %10 = vector.load %arg6[%c0_12, %c0_13] : memref<49x448xf32, #tpu.memory_space<vmem>>, vector<49x448xf32>
    tpu.vector_store %arg6[%c0_12, %c0_13], %9 {strides = array<i32>} : memref<49x448xf32, #tpu.memory_space<vmem>>, vector<49x448xf32>,
    %cst_14 = arith.constant 0.000000e+00 : f32
    %11 = vector.broadcast %cst_14 : f32 to vector<1x256xf32>
    %cst_15 = arith.constant 0.000000e+00 : f32
    %12 = vector.broadcast %cst_15 : f32 to vector<1x256xf32>
    %cst_16 = arith.constant 0.000000e+00 : f32
    %13 = vector.broadcast %cst_16 : f32 to vector<1x256xf32>
    %cst_17 = arith.constant 0.000000e+00 : f32
    %14 = vector.broadcast %cst_17 : f32 to vector<1x256xf32>
    %c0_18 = arith.constant 0 : index
    %c0_19 = arith.constant 0 : index
    %15 = vector.load %arg3[%c0_18, %c0_19] : memref<7x256xf32, #tpu.memory_space<vmem>>, vector<1x256xf32>
    %c0_20 = arith.constant 0 : index
    %c77 = arith.constant 77 : index
    %16 = vector.load %arg6[%c0_20, %c77] : memref<49x448xf32, #tpu.memory_space<vmem>>, vector<1x256xf32>
    %17 = arith.mulf %16, %15 : vector<1x256xf32>
    %18 = arith.addf %11, %17 : vector<1x256xf32>
    %c7 = arith.constant 7 : index
    %c93 = arith.constant 93 : index
    %19 = vector.load %arg6[%c7, %c93] : memref<49x448xf32, #tpu.memory_space<vmem>>, vector<1x256xf32>
    %20 = arith.mulf %19, %15 : vector<1x256xf32>
    %21 = arith.addf %12, %20 : vector<1x256xf32>
    %c14 = arith.constant 14 : index
    %c109 = arith.constant 109 : index
    %22 = vector.load %arg6[%c14, %c109] : memref<49x448xf32, #tpu.memory_space<vmem>>, vector<1x256xf32>
    %23 = arith.mulf %22, %15 : vector<1x256xf32>
    %24 = arith.addf %13, %23 : vector<1x256xf32>
    %c21 = arith.constant 21 : index
    %c125 = arith.constant 125 : index
    %25 = vector.load %arg6[%c21, %c125] : memref<49x448xf32, #tpu.memory_space<vmem>>, vector<1x256xf32>
    %26 = arith.mulf %25, %15 : vector<1x256xf32>
    %27 = arith.addf %14, %26 : vector<1x256xf32>
    %c28 = arith.constant 28 : index
    %c141 = arith.constant 141 : index
    %28 = vector.load %arg6[%c28, %c141] : memref<49x448xf32, #tpu.memory_space<vmem>>, vector<1x256xf32>
    %29 = arith.mulf %28, %15 : vector<1x256xf32>
    %30 = arith.addf %18, %29 : vector<1x256xf32>
    %c35 = arith.constant 35 : index
    %c157 = arith.constant 157 : index
    %31 = vector.load %arg6[%c35, %c157] : memref<49x448xf32, #tpu.memory_space<vmem>>, vector<1x256xf32>
    %32 = arith.mulf %31, %15 : vector<1x256xf32>
    %33 = arith.addf %21, %32 : vector<1x256xf32>
    %c42 = arith.constant 42 : index
    %c173 = arith.constant 173 : index
    %34 = vector.load %arg6[%c42, %c173] : memref<49x448xf32, #tpu.memory_space<vmem>>, vector<1x256xf32>
    %35 = arith.mulf %34, %15 : vector<1x256xf32>
    %36 = arith.addf %24, %35 : vector<1x256xf32>
    %c1 = arith.constant 1 : index
    %c0_21 = arith.constant 0 : index
    %37 = vector.load %arg3[%c1, %c0_21] : memref<7x256xf32, #tpu.memory_space<vmem>>, vector<1x256xf32>
    %c1_22 = arith.constant 1 : index
    %c78 = arith.constant 78 : index
    %38 = vector.load %arg6[%c1_22, %c78] : memref<49x448xf32, #tpu.memory_space<vmem>>, vector<1x256xf32>
    %39 = arith.mulf %38, %37 : vector<1x256xf32>
    %40 = arith.addf %27, %39 : vector<1x256xf32>
    %c8 = arith.constant 8 : index
    %c94 = arith.constant 94 : index
    %41 = vector.load %arg6[%c8, %c94] : memref<49x448xf32, #tpu.memory_space<vmem>>, vector<1x256xf32>
    %42 = arith.mulf %41, %37 : vector<1x256xf32>
    %43 = arith.addf %30, %42 : vector<1x256xf32>
    %c15 = arith.constant 15 : index
    %c110 = arith.constant 110 : index
    %44 = vector.load %arg6[%c15, %c110] : memref<49x448xf32, #tpu.memory_space<vmem>>, vector<1x256xf32>
    %45 = arith.mulf %44, %37 : vector<1x256xf32>
    %46 = arith.addf %33, %45 : vector<1x256xf32>
    %c22 = arith.constant 22 : index
    %c126 = arith.constant 126 : index
    %47 = vector.load %arg6[%c22, %c126] : memref<49x448xf32, #tpu.memory_space<vmem>>, vector<1x256xf32>
    %48 = arith.mulf %47, %37 : vector<1x256xf32>
    %49 = arith.addf %36, %48 : vector<1x256xf32>
    %c29 = arith.constant 29 : index
    %c142 = arith.constant 142 : index
    %50 = vector.load %arg6[%c29, %c142] : memref<49x448xf32, #tpu.memory_space<vmem>>, vector<1x256xf32>
    %51 = arith.mulf %50, %37 : vector<1x256xf32>
    %52 = arith.addf %40, %51 : vector<1x256xf32>
    %c36 = arith.constant 36 : index
    %c158 = arith.constant 158 : index
    %53 = vector.load %arg6[%c36, %c158] : memref<49x448xf32, #tpu.memory_space<vmem>>, vector<1x256xf32>
    %54 = arith.mulf %53, %37 : vector<1x256xf32>
    %55 = arith.addf %43, %54 : vector<1x256xf32>
    %c43 = arith.constant 43 : index
    %c174 = arith.constant 174 : index
    %56 = vector.load %arg6[%c43, %c174] : memref<49x448xf32, #tpu.memory_space<vmem>>, vector<1x256xf32>
    %57 = arith.mulf %56, %37 : vector<1x256xf32>
    %58 = arith.addf %46, %57 : vector<1x256xf32>
    %c2 = arith.constant 2 : index
    %c0_23 = arith.constant 0 : index
    %59 = vector.load %arg3[%c2, %c0_23] : memref<7x256xf32, #tpu.memory_space<vmem>>, vector<1x256xf32>
    %c2_24 = arith.constant 2 : index
    %c79 = arith.constant 79 : index
    %60 = vector.load %arg6[%c2_24, %c79] : memref<49x448xf32, #tpu.memory_space<vmem>>, vector<1x256xf32>
    %61 = arith.mulf %60, %59 : vector<1x256xf32>
    %62 = arith.addf %49, %61 : vector<1x256xf32>
    %c9 = arith.constant 9 : index
    %c95 = arith.constant 95 : index
    %63 = vector.load %arg6[%c9, %c95] : memref<49x448xf32, #tpu.memory_space<vmem>>, vector<1x256xf32>
    %64 = arith.mulf %63, %59 : vector<1x256xf32>
    %65 = arith.addf %52, %64 : vector<1x256xf32>
    %c16 = arith.constant 16 : index
    %c111 = arith.constant 111 : index
    %66 = vector.load %arg6[%c16, %c111] : memref<49x448xf32, #tpu.memory_space<vmem>>, vector<1x256xf32>
    %67 = arith.mulf %66, %59 : vector<1x256xf32>
    %68 = arith.addf %55, %67 : vector<1x256xf32>
    %c23 = arith.constant 23 : index
    %c127 = arith.constant 127 : index
    %69 = vector.load %arg6[%c23, %c127] : memref<49x448xf32, #tpu.memory_space<vmem>>, vector<1x256xf32>
    %70 = arith.mulf %69, %59 : vector<1x256xf32>
    %71 = arith.addf %58, %70 : vector<1x256xf32>
    %c30 = arith.constant 30 : index
    %c143 = arith.constant 143 : index
    %72 = vector.load %arg6[%c30, %c143] : memref<49x448xf32, #tpu.memory_space<vmem>>, vector<1x256xf32>
    %73 = arith.mulf %72, %59 : vector<1x256xf32>
    %74 = arith.addf %62, %73 : vector<1x256xf32>
    %c37 = arith.constant 37 : index
    %c159 = arith.constant 159 : index
    %75 = vector.load %arg6[%c37, %c159] : memref<49x448xf32, #tpu.memory_space<vmem>>, vector<1x256xf32>
    %76 = arith.mulf %75, %59 : vector<1x256xf32>
    %77 = arith.addf %65, %76 : vector<1x256xf32>
    %c44 = arith.constant 44 : index
    %c175 = arith.constant 175 : index
    %78 = vector.load %arg6[%c44, %c175] : memref<49x448xf32, #tpu.memory_space<vmem>>, vector<1x256xf32>
    %79 = arith.mulf %78, %59 : vector<1x256xf32>
    %80 = arith.addf %68, %79 : vector<1x256xf32>
    %c3 = arith.constant 3 : index
    %c80 = arith.constant 80 : index
    %81 = vector.load %arg6[%c3, %c80] : memref<49x448xf32, #tpu.memory_space<vmem>>, vector<1x256xf32>
    %82 = arith.addf %71, %81 : vector<1x256xf32>
    %c10 = arith.constant 10 : index
    %c96 = arith.constant 96 : index
    %83 = vector.load %arg6[%c10, %c96] : memref<49x448xf32, #tpu.memory_space<vmem>>, vector<1x256xf32>
    %84 = arith.addf %74, %83 : vector<1x256xf32>
    %c17 = arith.constant 17 : index
    %c112 = arith.constant 112 : index
    %85 = vector.load %arg6[%c17, %c112] : memref<49x448xf32, #tpu.memory_space<vmem>>, vector<1x256xf32>
    %86 = arith.addf %77, %85 : vector<1x256xf32>
    %c24 = arith.constant 24 : index
    %c128_25 = arith.constant 128 : index
    %87 = vector.load %arg6[%c24, %c128_25] : memref<49x448xf32, #tpu.memory_space<vmem>>, vector<1x256xf32>
    %88 = arith.addf %80, %87 : vector<1x256xf32>
    %c31 = arith.constant 31 : index
    %c144 = arith.constant 144 : index
    %89 = vector.load %arg6[%c31, %c144] : memref<49x448xf32, #tpu.memory_space<vmem>>, vector<1x256xf32>
    %90 = arith.addf %82, %89 : vector<1x256xf32>
    %c38 = arith.constant 38 : index
    %c160 = arith.constant 160 : index
    %91 = vector.load %arg6[%c38, %c160] : memref<49x448xf32, #tpu.memory_space<vmem>>, vector<1x256xf32>
    %92 = arith.addf %84, %91 : vector<1x256xf32>
    %c45 = arith.constant 45 : index
    %c176 = arith.constant 176 : index
    %93 = vector.load %arg6[%c45, %c176] : memref<49x448xf32, #tpu.memory_space<vmem>>, vector<1x256xf32>
    %94 = arith.addf %86, %93 : vector<1x256xf32>
    %c4 = arith.constant 4 : index
    %c0_26 = arith.constant 0 : index
    %95 = vector.load %arg3[%c4, %c0_26] : memref<7x256xf32, #tpu.memory_space<vmem>>, vector<1x256xf32>
    %c4_27 = arith.constant 4 : index
    %c81 = arith.constant 81 : index
    %96 = vector.load %arg6[%c4_27, %c81] : memref<49x448xf32, #tpu.memory_space<vmem>>, vector<1x256xf32>
    %97 = arith.mulf %96, %95 : vector<1x256xf32>
    %98 = arith.addf %88, %97 : vector<1x256xf32>
    %c11 = arith.constant 11 : index
    %c97 = arith.constant 97 : index
    %99 = vector.load %arg6[%c11, %c97] : memref<49x448xf32, #tpu.memory_space<vmem>>, vector<1x256xf32>
    %100 = arith.mulf %99, %95 : vector<1x256xf32>
    %101 = arith.addf %90, %100 : vector<1x256xf32>
    %c18 = arith.constant 18 : index
    %c113 = arith.constant 113 : index
    %102 = vector.load %arg6[%c18, %c113] : memref<49x448xf32, #tpu.memory_space<vmem>>, vector<1x256xf32>
    %103 = arith.mulf %102, %95 : vector<1x256xf32>
    %104 = arith.addf %92, %103 : vector<1x256xf32>
    %c25 = arith.constant 25 : index
    %c129 = arith.constant 129 : index
    %105 = vector.load %arg6[%c25, %c129] : memref<49x448xf32, #tpu.memory_space<vmem>>, vector<1x256xf32>
    %106 = arith.mulf %105, %95 : vector<1x256xf32>
    %107 = arith.addf %94, %106 : vector<1x256xf32>
    %c32 = arith.constant 32 : index
    %c145 = arith.constant 145 : index
    %108 = vector.load %arg6[%c32, %c145] : memref<49x448xf32, #tpu.memory_space<vmem>>, vector<1x256xf32>
    %109 = arith.mulf %108, %95 : vector<1x256xf32>
    %110 = arith.addf %98, %109 : vector<1x256xf32>
    %c39 = arith.constant 39 : index
    %c161 = arith.constant 161 : index
    %111 = vector.load %arg6[%c39, %c161] : memref<49x448xf32, #tpu.memory_space<vmem>>, vector<1x256xf32>
    %112 = arith.mulf %111, %95 : vector<1x256xf32>
    %113 = arith.addf %101, %112 : vector<1x256xf32>
    %c46 = arith.constant 46 : index
    %c177 = arith.constant 177 : index
    %114 = vector.load %arg6[%c46, %c177] : memref<49x448xf32, #tpu.memory_space<vmem>>, vector<1x256xf32>
    %115 = arith.mulf %114, %95 : vector<1x256xf32>
    %116 = arith.addf %104, %115 : vector<1x256xf32>
    %c5 = arith.constant 5 : index
    %c0_28 = arith.constant 0 : index
    %117 = vector.load %arg3[%c5, %c0_28] : memref<7x256xf32, #tpu.memory_space<vmem>>, vector<1x256xf32>
    %c5_29 = arith.constant 5 : index
    %c82 = arith.constant 82 : index
    %118 = vector.load %arg6[%c5_29, %c82] : memref<49x448xf32, #tpu.memory_space<vmem>>, vector<1x256xf32>
    %119 = arith.mulf %118, %117 : vector<1x256xf32>
    %120 = arith.addf %107, %119 : vector<1x256xf32>
    %c12 = arith.constant 12 : index
    %c98 = arith.constant 98 : index
    %121 = vector.load %arg6[%c12, %c98] : memref<49x448xf32, #tpu.memory_space<vmem>>, vector<1x256xf32>
    %122 = arith.mulf %121, %117 : vector<1x256xf32>
    %123 = arith.addf %110, %122 : vector<1x256xf32>
    %c19 = arith.constant 19 : index
    %c114 = arith.constant 114 : index
    %124 = vector.load %arg6[%c19, %c114] : memref<49x448xf32, #tpu.memory_space<vmem>>, vector<1x256xf32>
    %125 = arith.mulf %124, %117 : vector<1x256xf32>
    %126 = arith.addf %113, %125 : vector<1x256xf32>
    %c26 = arith.constant 26 : index
    %c130 = arith.constant 130 : index
    %127 = vector.load %arg6[%c26, %c130] : memref<49x448xf32, #tpu.memory_space<vmem>>, vector<1x256xf32>
    %128 = arith.mulf %127, %117 : vector<1x256xf32>
    %129 = arith.addf %116, %128 : vector<1x256xf32>
    %c33 = arith.constant 33 : index
    %c146 = arith.constant 146 : index
    %130 = vector.load %arg6[%c33, %c146] : memref<49x448xf32, #tpu.memory_space<vmem>>, vector<1x256xf32>
    %131 = arith.mulf %130, %117 : vector<1x256xf32>
    %132 = arith.addf %120, %131 : vector<1x256xf32>
    %c40 = arith.constant 40 : index
    %c162 = arith.constant 162 : index
    %133 = vector.load %arg6[%c40, %c162] : memref<49x448xf32, #tpu.memory_space<vmem>>, vector<1x256xf32>
    %134 = arith.mulf %133, %117 : vector<1x256xf32>
    %135 = arith.addf %123, %134 : vector<1x256xf32>
    %c47 = arith.constant 47 : index
    %c178 = arith.constant 178 : index
    %136 = vector.load %arg6[%c47, %c178] : memref<49x448xf32, #tpu.memory_space<vmem>>, vector<1x256xf32>
    %137 = arith.mulf %136, %117 : vector<1x256xf32>
    %138 = arith.addf %126, %137 : vector<1x256xf32>
    %c6 = arith.constant 6 : index
    %c0_30 = arith.constant 0 : index
    %139 = vector.load %arg3[%c6, %c0_30] : memref<7x256xf32, #tpu.memory_space<vmem>>, vector<1x256xf32>
    %c6_31 = arith.constant 6 : index
    %c83 = arith.constant 83 : index
    %140 = vector.load %arg6[%c6_31, %c83] : memref<49x448xf32, #tpu.memory_space<vmem>>, vector<1x256xf32>
    %141 = arith.mulf %140, %139 : vector<1x256xf32>
    %142 = arith.addf %129, %141 : vector<1x256xf32>
    %c13 = arith.constant 13 : index
    %c99 = arith.constant 99 : index
    %143 = vector.load %arg6[%c13, %c99] : memref<49x448xf32, #tpu.memory_space<vmem>>, vector<1x256xf32>
    %144 = arith.mulf %143, %139 : vector<1x256xf32>
    %145 = arith.addf %132, %144 : vector<1x256xf32>
    %c20 = arith.constant 20 : index
    %c115 = arith.constant 115 : index
    %146 = vector.load %arg6[%c20, %c115] : memref<49x448xf32, #tpu.memory_space<vmem>>, vector<1x256xf32>
    %147 = arith.mulf %146, %139 : vector<1x256xf32>
    %148 = arith.addf %135, %147 : vector<1x256xf32>
    %c27 = arith.constant 27 : index
    %c131 = arith.constant 131 : index
    %149 = vector.load %arg6[%c27, %c131] : memref<49x448xf32, #tpu.memory_space<vmem>>, vector<1x256xf32>
    %150 = arith.mulf %149, %139 : vector<1x256xf32>
    %151 = arith.addf %138, %150 : vector<1x256xf32>
    %c34 = arith.constant 34 : index
    %c147 = arith.constant 147 : index
    %152 = vector.load %arg6[%c34, %c147] : memref<49x448xf32, #tpu.memory_space<vmem>>, vector<1x256xf32>
    %153 = arith.mulf %152, %139 : vector<1x256xf32>
    %154 = arith.addf %142, %153 : vector<1x256xf32>
    %c41 = arith.constant 41 : index
    %c163 = arith.constant 163 : index
    %155 = vector.load %arg6[%c41, %c163] : memref<49x448xf32, #tpu.memory_space<vmem>>, vector<1x256xf32>
    %156 = arith.mulf %155, %139 : vector<1x256xf32>
    %157 = arith.addf %145, %156 : vector<1x256xf32>
    %c48 = arith.constant 48 : index
    %c179 = arith.constant 179 : index
    %158 = vector.load %arg6[%c48, %c179] : memref<49x448xf32, #tpu.memory_space<vmem>>, vector<1x256xf32>
    %159 = arith.mulf %158, %139 : vector<1x256xf32>
    %160 = arith.addf %148, %159 : vector<1x256xf32>
    %161 = arith.addf %160, %151 : vector<1x256xf32>
    %162 = arith.addf %154, %157 : vector<1x256xf32>
    %163 = arith.addf %161, %162 : vector<1x256xf32>
    %164 = arith.negf %163 : vector<1x256xf32>
    %165 = math.exp %164 : vector<1x256xf32>
    %cst_32 = arith.constant 1.000000e+00 : f32
    %166 = vector.broadcast %cst_32 : f32 to vector<1x256xf32>
    %167 = arith.addf %166, %165 : vector<1x256xf32>
    %168 = arith.divf %166, %167 : vector<1x256xf32>
    %c0_33 = arith.constant 0 : index
    %c0_34 = arith.constant 0 : index
    %c0_35 = arith.constant 0 : index
    %169 = vector.load %arg1[%c0_33, %c0_34, %c0_35] : memref<1x4x256xf32, #tpu.memory_space<vmem>>, vector<1x4x256xf32>
    %170 = vector.shape_cast %169 : vector<1x4x256xf32> to vector<4x256xf32>
    %171 = vector.broadcast %168 : vector<1x256xf32> to vector<4x256xf32>
    %172 = arith.mulf %170, %171 : vector<4x256xf32>
    %c0_36 = arith.constant 0 : index
    %c0_37 = arith.constant 0 : index
    %c0_38 = arith.constant 0 : index
    %173 = vector.load %arg4[%c0_36, %c0_37, %c0_38] : memref<1x4x256xf32, #tpu.memory_space<vmem>>, vector<1x4x256xf32>
    %174 = vector.shape_cast %173 : vector<1x4x256xf32> to vector<4x256xf32>
    %175 = vector.shape_cast %172 : vector<4x256xf32> to vector<1x4x256xf32>
    tpu.vector_store %arg4[%c0_36, %c0_37, %c0_38], %175 {strides = array<i32>} : memref<1x4x256xf32, #tpu.memory_space<vmem>>, vector<1x4x256xf32>,
    return
  }
  func.func @transform_0(%arg0: i32) -> (i32, i32, i32) {
    %c0_i32 = arith.constant 0 : i32
    %c0_i32_0 = arith.constant 0 : i32
    %c0_i32_1 = arith.constant 0 : i32
    return %arg0, %c0_i32, %c0_i32_0 : i32, i32, i32
  }
  func.func @transform_1(%arg0: i32) -> (i32, i32) {
    %c0_i32 = arith.constant 0 : i32
    %c0_i32_0 = arith.constant 0 : i32
    %c0_i32_1 = arith.constant 0 : i32
    return %c0_i32, %c0_i32_0 : i32, i32
  }
  func.func @transform_2(%arg0: i32) -> (i32, i32) {
    %c0_i32 = arith.constant 0 : i32
    %c0_i32_0 = arith.constant 0 : i32
    %c0_i32_1 = arith.constant 0 : i32
    return %c0_i32, %c0_i32_0 : i32, i32
  }
  func.func @transform_3(%arg0: i32) -> (i32, i32, i32) {
    %c0_i32 = arith.constant 0 : i32
    %c0_i32_0 = arith.constant 0 : i32
    %c0_i32_1 = arith.constant 0 : i32
    return %arg0, %c0_i32, %c0_i32_0 : i32, i32, i32
  }
}

</mosaic_0001>

<bundles_post_ra>
// kernel: tpu_custom_call.1
= control target key start
LH: loop header
LB: loop body
LE: loop exit
PB: predicated region body
PF: predicated region fallthrough
CT: control target
= control target key end

     0   :  { %8 = vsyncpa [#allocation5], 0  ;;  %s2054_s0 = inlined_call_operand.vmem [shape: f32[2,4,256], index: 0, kind: input, shape index: {}]   ;;  %s2055_s1 = inlined_call_operand.vmem [shape: f32[49,4], index: 1, kind: input, shape index: {}]   ;;  %s2056_s2 = inlined_call_operand.vmem [shape: f32[7,256], index: 2, kind: input, shape index: {}]   ;;  %s2057_s3 = inlined_call_operand.hbm [shape: f32[2,4,256], index: 3, kind: output, shape index: {}]  }
   0x1   :  { %10 = vsyncpa [#allocation5 + $0x1], 0  ;;  %s1557_s12 = smov 0   ;;  %s1559_s13 = smov 0  }
   0x2   :  { %s1561_s14 = smov 0   ;;  %s1563_s15 = smov 0  }
   0x3 LB: > { %s1578_s16 = sadd.s32 4294967295, %s1483_s15   ;;  %s1274_s17 = sadd.s32 4294967294, %s1483_s15   ;;  %s1483_s15 = sphi %s1563_s15, %s2066_s15   ;;  %s1479_s14 = sphi %s1561_s14, %s2065_s14   ;;  %s1475_s13 = sphi %s1559_s13, %s2064_s13   ;;  %s1471_s12 = sphi %s1557_s12, %s2063_s12  }
   0x4   : > { %s1582_s18 = sadd.s32 1, %s1483_s15   ;;  %s91_s19 = sadd.s32 1, %s1479_s14 }
   0x5   : > { %s88_s20 = ssub.s32 %s1483_s15, %s1582_s18  ;;  %p101_p0 = scmp.ne.s32.totalorder %s1479_s14, %s1475_s13 }
   0x6   : > { %p89_p1 = scmp.eq.s32.totalorder %s88_s20, 0  ;;  %p102_p2 = scmp.eq.s32.totalorder %s1578_s16, 1 }
   0x7   : > { %p107_p3 = scmp.ne.s32.totalorder %s1475_s13, %s1471_s12  ;;  %p108_p4 = scmp.eq.s32.totalorder %s1274_s17, 1 }
   0x8   : > { %s1593_s21 = scalar_select %p89_p1, %s1479_s14, %s91_s19  }
   0x9   : > { %p1595_p5 = por %p102_p2, %p101_p0  ;;  %p1599_p6 = por %p108_p4, %p107_p3 }
   0xa   : > { %p1277_p7 = scmp.ge.s32.totalorder %s1483_s15, 1  ;;  %p140_p8 = scmp.lt.s32.totalorder %s1483_s15, 3 }
   0xc   : > { %p141_p9 = pnand %p1277_p7, %p140_p8 }
   0xd   : > { %s1485_s26 = smov (!%p141_p9), 95   ;;  %s1486_s29 = smov (!%p141_p9), 78  }
   0xe   : > { %144 = sbr.rel (%p141_p9) target bundleno = 763 (0x2fb), region = 32  ;;  %s1487_s5 = smov (!%p141_p9), 77  }
   0xf   : > { %p164_p10 = scmp.lt.s32.totalorder (!%p141_p9), %s1578_s16, 1  ;;  %s1489_s10 = smov (!%p141_p9), 31  }
  0x10   : > { %s1490_s20 = smov (!%p141_p9), 14   ;;  %s1491_s24 = smov (!%p141_p9), 1  }
  0x11   : > { %s1493_s30 = smov (!%p141_p9), 82   ;;  %s1494_s4 = smov (!%p141_p9), 99  }
  0x12   : > { %s1495_s8 = smov (!%p141_p9), 93   ;;  %s1500_s25 = smov (!%p141_p9), 97  }
  0x13   : > { %v1608_v0 = vld [vmem:[%s2056_s2 + $0x2] ss:$8 sm:$0x3]  ;;  %v1614_v1 = vld [vmem:[%s2056_s2 + $0x1] ss:$8 sm:$0x3] }
  0x14   : > { %632 = vrot.lane.b32.xlu1 %v1608_v0, %s1485_s26  ;;  %vm170_vm0 = vcmask 519168   ;;  %499 = vrot.lane.b32.xlu0 %v1614_v1, %s1486_s29  ;;  %v1620_v2 = vld [vmem:[%s2056_s2] ss:$8 sm:$0x3]  ;;  %v1488_v3 = vmov 0.0   ;;  %s165_s6 = scalar_select %p164_p10, %s1578_s16, 1 }
  0x15   : > { %408 = vrot.lane.b32.xlu2 %v1620_v2, %s1487_s5  ;;  %171 = vst.msk [vmem:[#allocation2 + $0xc] sm:$0xf] %vm170_vm0, %v1488_v3  ;;  %v1629_v4 = vld [vmem:[%s2056_s2 + $0x4] ss:$8 sm:$0x3]  ;;  %s1492_s29 = smov 18  }
  0x16   : > { %169 = vst [vmem:[#allocation2] sm:$0xf] %v1488_v3  ;;  %s1324_s9 = sshll.u32 %s165_s6, 3  ;;  %v1643_v6 = vld [vmem:[%s2056_s2 + $0x5] ss:$8 sm:$0x3] }
  0x17   : > { %s1635_s19 = scalar_lea.vmem %s2054_s0, %s1324_s9  ;;  %v1648_v7 = vld [vmem:[%s2056_s2 + $0x6] ss:$8 sm:$0x3]  ;;  %vm2058_vm1 = vcmask 1043456   ;;  %vm192_vm2 = vcmask 31744   ;;  %s1496_s9 = smov 35  }
  0x18   : > { %v172_v5 = vld [vmem:[%s1635_s19] sm:$0xff]  ;;  %v175_v15 = vld [vmem:[%s2055_s1 + $0x8] sm:$0xff]  ;;  %v176_v16 = vld [vmem:[%s2055_s1 + $0x10] sm:$0xff]  ;;  %s1501_s28 = smov 45   ;;  %s1504_s7 = smov 126   ;;  %vm378_vm3 = vcmask 523264  }
  0x19   : > { %173 = vst [vmem:[#allocation2 + $0x4] sm:$0xff] %v172_v5  ;;  %v174_v10 = vld [vmem:[%s2055_s1] sm:$0xff]  ;;  %v177_v17 = vld [vmem:[%s2055_s1 + $0x18] sm:$0xff]  ;;  %s1507_s17 = smov 79   ;;  %v179_v19 = vld [vmem:[%s2055_s1 + $0x28] sm:$0xff]  ;;  %s1514_s6 = smov 94  }
  0x1a   : > { %v178_v18 = vld [vmem:[%s2055_s1 + $0x20] sm:$0xff]  ;;  %s1519_s11 = smov 83   ;;  %vm912_vm4 = vcmask 670720   ;;  %vm502_vm5 = vcmask 637952   ;;  %vm536_vm6 = vcmask 900096   ;;  %vm619_vm7 = vcmask 646144  }
  0x1b   : > { %vm635_vm8 = vcmask 777216   ;;  %vm1046_vm9 = vcmask 809984   ;;  %vm666_vm10 = vcmask 1039360   ;;  %s1523_s26 = smov 26   ;;  %vm552_vm11 = vcmask 1031168   ;;  %s1524_s27 = smov 64  }
  0x1c   : > { %695 = vrot.lane.b32.xlu1 %v1608_v0, %s1489_s10  ;;  %565 = vrot.lane.b32.xlu0 %v1614_v1, %s1490_s20  ;;  %s1497_s10 = smov 109   ;;  %s1498_s20 = smov 13   ;;  %vm451_vm12 = vcmask 105472   ;;  %vm844_vm13 = vcmask 7168   ;;  %vm568_vm14 = vcmask 113664   ;;  %vm682_vm15 = vcmask 121856  }
  0x1d   : > { %841 = vrot.lane.b32.xlu2 %v1629_v4, %s1491_s24  ;;  %s1499_s24 = smov 125   ;;  %vm698_vm0 = vcmask 252928  }
  0x20   : > { %v182_v8 = vld [vmem:[#allocation2 + $0x8] sm:$0xff]  ;;  %v181_v9 = vld [vmem:[#allocation2] sm:$0xff] }
  0x21   : > { %187 = vst [vmem:[#allocation1 + $0x10] ss:$2 sm:$0xff] %v182_v8 }
  0x22   : > { %185 = vst [vmem:[#allocation1] ss:$2 sm:$0xff] %v181_v9 }
  0x24   : > { %975 = vrot.lane.b32.xlu1 %v1643_v6, %s1492_s29  ;;  %909 = vrot.lane.b32.xlu0 %v1643_v6, %s1493_s30  ;;  %s1502_s29 = smov 29   ;;  %s1503_s30 = smov 33  }
  0x25   : > { %1043 = vrot.lane.b32.xlu2 %v1648_v7, %s1494_s4  ;;  %s1513_s4 = smov 113  }
  0x28   : > { %v190_v11 = vld.sshfl [vmem:[#allocation1 + $0x10] sm:$0xff pattern:$0x75316420]  ;;  %v191_v12 = vld.sshfl [vmem:[#allocation1 + $0x18] sm:$0xff pattern:$0x75316420] }
  0x29   : > { %1297 = vmatpush.msk.msra.mxu2 %vm2058_vm1, %v190_v11  ;;  %1305 = vmatpush.msk.msra.mxu3 %vm2058_vm1, %v191_v12  ;;  %v188_v13 = vld.sshfl [vmem:[#allocation1] sm:$0xff pattern:$0x75316420]  ;;  %v189_v14 = vld.sshfl [vmem:[#allocation1 + $0x8] sm:$0xff pattern:$0x75316420] }
  0x2a   : > { %1298 = vmatmul.msk.f32.vlgmr.msra.gmra.mxu2 %vm192_vm2, %v174_v10  ;;  %1306 = vmatmul.msk.f32.vlgmr.msra.gmra.mxu3 %vm192_vm2, %v174_v10 }
  0x2b   : > { %1281 = vmatpush.msk.msra.mxu0 %vm2058_vm1, %v188_v13  ;;  %1289 = vmatpush.msk.msra.mxu1 %vm2058_vm1, %v189_v14  ;;  %vm994_vm1 = vcmask 277504  }
  0x2c   : > { %418 = vrot.lane.b32.xlu1 %v1620_v2, %s1495_s8  ;;  %1108 = vrot.lane.b32.xlu0 %v1648_v7, %s1496_s9  ;;  %s1505_s8 = smov 110   ;;  %s1506_s9 = smov 114  }
  0x2d   : > { %1282 = vmatmul.msk.f32.vlgmr.msra.gmra.mxu0 %vm192_vm2, %v174_v10  ;;  %1290 = vmatmul.msk.f32.vlgmr.msra.gmra.mxu1 %vm192_vm2, %v174_v10 }
  0x2e   : > { %428 = vrot.lane.b32.xlu2 %v1620_v2, %s1497_s10  ;;  %s1518_s10 = smov 111  }
  0x32   : > { %1299 = vmatmul.msk.f32.gmra.mxu2 %vm192_vm2, %v175_v15  ;;  %1307 = vmatmul.msk.f32.gmra.mxu3 %vm192_vm2, %v175_v15 }
  0x34   : > { %448 = vrot.lane.b32.xlu1 %v1620_v2, %s1498_s20  ;;  %438 = vrot.lane.b32.xlu0 %v1620_v2, %s1499_s24  ;;  %s1508_s24 = smov 46  }
  0x35   : > { %1283 = vmatmul.msk.f32.gmra.mxu0 %vm192_vm2, %v175_v15  ;;  %1291 = vmatmul.msk.f32.gmra.mxu1 %vm192_vm2, %v175_v15 }
  0x36   : > { %809 = vrot.lane.b32.xlu2 %v1629_v4, %s1500_s25  ;;  %s1509_s25 = smov 50  }
  0x3a   : > { %1300 = vmatmul.msk.f32.gmra.mxu2 %vm192_vm2, %v176_v16  ;;  %1308 = vmatmul.msk.f32.gmra.mxu3 %vm192_vm2, %v176_v16 }
  0x3c   : > { %480 = vrot.lane.b32.xlu1 %v1620_v2, %s1501_s28  ;;  %464 = vrot.lane.b32.xlu0 %v1620_v2, %s1502_s29  ;;  %s1510_s28 = smov 15   ;;  %s1511_s29 = smov 127  }
  0x3d   : > { %1284 = vmatmul.msk.f32.gmra.mxu0 %vm192_vm2, %v176_v16  ;;  %1292 = vmatmul.msk.f32.gmra.mxu1 %vm192_vm2, %v176_v16 }
  0x3e   : > { %874 = vrot.lane.b32.xlu2 %v1629_v4, %s1503_s30  ;;  %s1512_s30 = smov 3  }
  0x42   : > { %1301 = vmatmul.msk.f32.gmra.mxu2 %vm192_vm2, %v177_v17  ;;  %1309 = vmatmul.msk.f32.gmra.mxu3 %vm192_vm2, %v177_v17 }
  0x44   : > { %549 = vrot.lane.b32.xlu1 %v1614_v1, %s1504_s7  ;;  %533 = vrot.lane.b32.xlu0 %v1614_v1, %s1505_s8  ;;  %s1515_s7 = smov 49   ;;  %s1516_s8 = smov 30  }
  0x45   : > { %1293 = vmatmul.msk.f32.gmra.mxu1 %vm192_vm2, %v177_v17  ;;  %1285 = vmatmul.msk.f32.gmra.mxu0 %vm192_vm2, %v177_v17 }
  0x46   : > { %943 = vrot.lane.b32.xlu2 %v1643_v6, %s1506_s9  ;;  %s1517_s9 = smov 2  }
  0x4a   : > { %1302 = vmatmul.msk.f32.gmra.mxu2 %vm192_vm2, %v178_v18  ;;  %1310 = vmatmul.msk.f32.gmra.mxu3 %vm192_vm2, %v178_v18 }
  0x4c   : > { %616 = vrot.lane.b32.xlu1 %v1608_v0, %s1507_s17  ;;  %597 = vrot.lane.b32.xlu0 %v1614_v1, %s1508_s24  ;;  %s1520_s17 = smov 47   ;;  %s1521_s24 = smov 19  }
  0x4d   : > { %1294 = vmatmul.msk.f32.gmra.mxu1 %vm192_vm2, %v178_v18  ;;  %1286 = vmatmul.msk.f32.gmra.mxu0 %vm192_vm2, %v178_v18 }
  0x4e   : > { %1007 = vrot.lane.b32.xlu2 %v1643_v6, %s1509_s25  ;;  %s1522_s25 = smov 43  }
  0x52   : > { %1303 = vmatmul.msk.f32.gmra.mxu2 %vm192_vm2, %v179_v19  ;;  %1311 = vmatmul.msk.f32.gmra.mxu3 %vm192_vm2, %v179_v19 }
  0x54   : > { %679 = vrot.lane.b32.xlu1 %v1608_v0, %s1510_s28  ;;  %663 = vrot.lane.b32.xlu0 %v1608_v0, %s1511_s29  ;;  %s1525_s28 = smov 124   ;;  %s1526_s29 = smov 81  }
  0x55   : > { %1295 = vmatmul.msk.f32.gmra.mxu1 %vm192_vm2, %v179_v19  ;;  %1287 = vmatmul.msk.f32.gmra.mxu0 %vm192_vm2, %v179_v19 }
  0x56   : > { %1076 = vrot.lane.b32.xlu2 %v1648_v7, %s1512_s30  ;;  %s1527_s30 = smov 17  }
  0x5c   : > { %825 = vrot.lane.b32.xlu0 %v1629_v4, %s1513_s4 }
  0x5e   : > { %516 = vrot.lane.b32.xlu2 %v1614_v1, %s1514_s6 }
  0x64   : > { %890 = vrot.lane.b32.xlu0 %v1629_v4, %s1515_s7 }
  0x66   : > { %581 = vrot.lane.b32.xlu2 %v1614_v1, %s1516_s8 }
  0x6c   : > { %959 = vrot.lane.b32.xlu0 %v1643_v6, %s1517_s9  ;;  %s1529_s9 = smov 60  }
  0x6e   : > { %648 = vrot.lane.b32.xlu2 %v1608_v0, %s1518_s10 }
  0x6f   : > { %v1739_v27 = vpop.permute.xlu2 %408 }
  0x74   : > { %1026 = vrot.lane.b32.xlu0 %v1648_v7, %s1519_s11  ;;  %s1530_s11 = smov 90  }
  0x76   : > { %711 = vrot.lane.b32.xlu2 %v1608_v0, %s1520_s17 }
  0x77   : > { %v1747_v31 = vpop.permute.xlu2 %841 }
  0x7c   : > { %1092 = vrot.lane.b32.xlu0 %v1648_v7, %s1521_s24  ;;  %s1531_s24 = smov 98  }
  0x7f   : > { %v1044_v38 = vpop.permute.xlu2 %1043 }
  0x80   : > { %v1045_v10 = vrot.slane %v1044_v38, 7 }
  0x82   : > { %v1047_v14 = vsel %vm1046_vm9, %v1045_v10, %v1044_v38  ;;  %vm877_vm9 = vcmask 269312  }
  0x86   : > { %v633_v20 = vpop.permute.xlu1 %632  ;;  %v500_v21 = vpop.permute.xlu0 %499 }
  0x87   : > { %v501_v40 = vrot.slane %v500_v21, 7  ;;  %v634_v55 = vrot.slane %v633_v20, 7 }
  0x88   : > { %v1755_v53 = vpop.permute.xlu2 %428 }
  0x89   : > { %v503_v46 = vsel %vm502_vm5, %v501_v40, %v500_v21  ;;  %v636_v0 = vsel %vm635_vm8, %v634_v55, %v633_v20  ;;  %vm467_vm5 = vcmask 236544   ;;  %vm978_vm8 = vcmask 146432  }
  0x8e   : > { %v1731_v22 = vpop.permute.xlu1 %695  ;;  %v1733_v23 = vpop.permute.xlu0 %565 }
  0x90   : > { %v1764_v12 = vpop.permute.xlu2 %809 }
  0x96   : > { %v1735_v24 = vpop.permute.xlu1 %975  ;;  %v910_v25 = vpop.permute.xlu0 %909 }
  0x97   : > { %v911_v39 = vrot.slane %v910_v25, 7 }
  0x99   : > { %v913_v45 = vsel %vm912_vm4, %v911_v39, %v910_v25  ;;  %v1771_v39 = vpop.permute.xlu2 %874  ;;  %vm828_vm4 = vcmask 924672  }
  0x9e   : > { %v1737_v26 = vpop.permute.xlu1 %418  ;;  %v1741_v28 = vpop.permute.xlu0 %1108 }
  0xa6   : > { %v1743_v29 = vpop.permute.xlu1 %448  ;;  %v1745_v30 = vpop.permute.xlu0 %438 }
  0xaa   : > { %v240_v33 = vpop.f32.mrf.mxu0  ;;  %v278_v35 = vpop.f32.mrf.mxu1 }
  0xab   : > { %375 = vst [vmem:[#allocation3] sm:$0xff] %v240_v33  ;;  %v450_v33 = vrot.slane %v1743_v29, 7 }
  0xac   : > { %376 = vst [vmem:[#allocation3 + $0x8] sm:$0xff] %v278_v35 }
  0xad   : > { %v316_v36 = vpop.f32.mrf.mxu2  ;;  %v354_v37 = vpop.f32.mrf.mxu3 }
  0xae   : > { %v1749_v32 = vpop.permute.xlu1 %480  ;;  %v1751_v34 = vpop.permute.xlu0 %464  ;;  %377 = vst [vmem:[#allocation3 + $0x10] sm:$0xff] %v316_v36 }
  0xb2   : > { %v243_v42 = vpop.f32.mrf.mxu0  ;;  %v281_v44 = vpop.f32.mrf.mxu1 }
  0xb3   : > { %380 = vst [vmem:[#allocation3 + $0x20] sm:$0xff] %v243_v42 }
  0xb4   : > { %381 = vst [vmem:[#allocation3 + $0x28] sm:$0xff] %v281_v44 }
  0xb5   : > { %v319_v47 = vpop.f32.mrf.mxu2  ;;  %v357_v48 = vpop.f32.mrf.mxu3  ;;  %v907_v49 = vld [vmem:[#allocation3 + $0x5] ss:$8 sm:$0x7]  ;;  %v497_v50 = vld [vmem:[#allocation3 + $0x1] ss:$8 sm:$0x7] }
  0xb6   : > { %v1753_v41 = vpop.permute.xlu1 %549  ;;  %v534_v43 = vpop.permute.xlu0 %533  ;;  %382 = vst [vmem:[#allocation3 + $0x30] sm:$0xff] %v319_v47  ;;  %v915_v51 = vmul.f32 %v913_v45, %v907_v49  ;;  %v505_v52 = vmul.f32 %v503_v46, %v497_v50  ;;  %v614_v62 = vld [vmem:[#allocation3 + $0x2] ss:$8 sm:$0x7]  ;;  %v452_v45 = vsel %vm451_vm12, %v450_v33, %v1743_v29  ;;  %v843_v49 = vrot.slane %v1747_v31, 7 }
  0xb7   : > { %v535_v54 = vrot.slane %v534_v43, 7  ;;  %v551_v25 = vrot.slane %v1753_v41, 7  ;;  %v811_v33 = vrot.slane %v1764_v12, 7 }
  0xb8   : > { %917 = vrot.lane.b32.xlu1 %v915_v51, %s1522_s25  ;;  %507 = vrot.lane.b32.xlu2 %v505_v52, %s1520_s17 }
  0xb9   : > { %v537_v61 = vsel %vm536_vm6, %v535_v54, %v534_v43  ;;  %v553_v40 = vsel %vm552_vm11, %v551_v25, %v1753_v41  ;;  %v567_v41 = vrot.slane %v1733_v23, 7  ;;  %v845_v54 = vsel %vm844_vm13, %v843_v49, %v1747_v31 }
  0xba   : > { %v246_v57 = vpop.f32.mrf.mxu0  ;;  %v284_v60 = vpop.f32.mrf.mxu1  ;;  %vm812_vm6 = vcmask 793600   ;;  %v876_v49 = vrot.slane %v1771_v39, 7  ;;  %vm1111_vm11 = vcmask 285696   ;;  %vm946_vm13 = vcmask 932864  }
  0xbb   : > { %384 = vst [vmem:[#allocation3 + $0x40] sm:$0xff] %v246_v57  ;;  %v569_v57 = vsel %vm568_vm14, %v567_v41, %v1733_v23  ;;  %v697_v23 = vrot.slane %v1731_v22, 7  ;;  %vm600_vm14 = vcmask 375808  }
  0xbc   : > { %385 = vst [vmem:[#allocation3 + $0x48] sm:$0xff] %v284_v60  ;;  %v1784_v60 = vpop.permute.xlu2 %943 }
  0xbd   : > { %v322_v2 = vpop.f32.mrf.mxu2  ;;  %v360_v3 = vpop.f32.mrf.mxu3  ;;  %v631_v5 = vld [vmem:[#allocation3 + $0x21] ss:$8 sm:$0x7]  ;;  %v532_v9 = vld [vmem:[#allocation3 + $0x27] ss:$8 sm:$0x7] }
  0xbe   : > { %v617_v56 = vpop.permute.xlu1 %616  ;;  %v1759_v58 = vpop.permute.xlu0 %597  ;;  %386 = vst [vmem:[#allocation3 + $0x50] sm:$0xff] %v322_v2  ;;  %v638_v8 = vmul.f32 %v636_v0, %v631_v5  ;;  %v539_v11 = vmul.f32 %v537_v61, %v532_v9  ;;  %v1042_v15 = vld [vmem:[#allocation3 + $0x25] ss:$8 sm:$0x7]  ;;  %v699_v3 = vsel %vm698_vm0, %v697_v23, %v1731_v22  ;;  %vm1079_vm0 = vcmask 23552  }
  0xbf   : > { %v618_v59 = vrot.slane %v617_v56, 7  ;;  %v1049_v21 = vmul.f32 %v1047_v14, %v1042_v15  ;;  %v734_v0 = vld [vmem:[#allocation3 + $0x22] ss:$8 sm:$0x7] }
  0xc0   : > { %640 = vrot.lane.b32.xlu2 %v638_v8, %s1516_s8  ;;  %541 = vrot.lane.b32.xlu0 %v539_v11, %s1518_s10 }
  0xc1   : > { %v620_v63 = vsel %vm619_vm7, %v618_v59, %v617_v56  ;;  %vm962_vm7 = vcmask 15360  }
  0xc2   : > { %v622_v1 = vmul.f32 %v620_v63, %v614_v62  ;;  %v287_v13 = vpop.f32.mrf.mxu1 }
  0xc3   : > { %389 = vst [vmem:[#allocation3 + $0x68] sm:$0xff] %v287_v13 }
  0xc4   : > { %624 = vrot.lane.b32.xlu1 %v622_v1, %s1516_s8  ;;  %v1793_v11 = vpop.permute.xlu2 %1007 }
  0xc5   : > { %v325_v17 = vpop.f32.mrf.mxu2  ;;  %v363_v18 = vpop.f32.mrf.mxu3  ;;  %v743_v20 = vld [vmem:[#allocation3 + $0x41] ss:$8 sm:$0x7]  ;;  %v662_v35 = vld [vmem:[#allocation3 + $0x47] ss:$8 sm:$0x7] }
  0xc6   : > { %v664_v16 = vpop.permute.xlu0 %663  ;;  %390 = vst [vmem:[#allocation3 + $0x70] sm:$0xff] %v325_v17  ;;  %v548_v38 = vld [vmem:[#allocation3 + $0x46] ss:$8 sm:$0x7]  ;;  %v680_v51 = vpop.permute.xlu1 %679 }
  0xc7   : > { %v665_v19 = vrot.slane %v664_v16, 7  ;;  %391 = vst.msk [vmem:[#allocation3 + $0x78] sm:$0xff] %vm378_vm3, %v363_v18  ;;  %v555_v47 = vmul.f32 %v553_v40, %v548_v38  ;;  %v681_v62 = vrot.slane %v680_v51, 7  ;;  %v824_v14 = vld [vmem:[#allocation3 + $0x42] ss:$8 sm:$0x7]  ;;  %v813_v38 = vsel %vm812_vm6, %v811_v33, %v1764_v12 }
  0xc8   : > { %745 = vrot.lane.b32.xlu0 %v743_v20, %s1498_s20  ;;  %v725_v17 = vld [vmem:[#allocation3 + $0x3] ss:$8 sm:$0x7]  ;;  %vm584_vm6 = vcmask 244736  }
  0xc9   : > { %v667_v36 = vsel %vm666_vm10, %v665_v19, %v664_v16  ;;  %v683_v1 = vsel %vm682_vm15, %v681_v62, %v680_v51  ;;  %v466_v16 = vrot.slane %v1751_v34, 7  ;;  %vm1029_vm10 = vcmask 678912   ;;  %v180_v51 = vld [vmem:[%s2055_s1 + $0x30] sm:$0x1] }
  0xca   : > { %v290_v37 = vpop.f32.mrf.mxu1  ;;  %v669_v42 = vmul.f32 %v667_v36, %v662_v35  ;;  %1304 = vmatmul.msk.f32.gmra.mxu2 %vm192_vm2, %v180_v51  ;;  %1312 = vmatmul.msk.f32.gmra.mxu3 %vm192_vm2, %v180_v51  ;;  %v942_v23 = vld [vmem:[#allocation3 + $0x43] ss:$8 sm:$0x7]  ;;  %vm893_vm15 = vcmask 400384  }
  0xcb   : > { %393 = vst [vmem:[#allocation3 + $0x88] sm:$0xff] %v290_v37  ;;  %v468_v18 = vsel %vm467_vm5, %v466_v16, %v1751_v34  ;;  %v977_v37 = vrot.slane %v1735_v24, 7  ;;  %1296 = vmatmul.msk.f32.gmra.mxu1 %vm192_vm2, %v180_v51  ;;  %1288 = vmatmul.msk.f32.gmra.mxu0 %vm192_vm2, %v180_v51  ;;  %vm1010_vm2 = vcmask 408576   ;;  %vm519_vm5 = vcmask 769024  }
  0xcc   : > { %1051 = vrot.lane.b32.xlu1 %v1049_v21, %s1523_s26  ;;  %v1804_v20 = vpop.permute.xlu2 %1076 }
  0xcd   : > { %v328_v43 = vpop.f32.mrf.mxu2  ;;  %v366_v44 = vpop.f32.mrf.mxu3 }
  0xce   : > { %394 = vst [vmem:[#allocation3 + $0x90] sm:$0xff] %v328_v43  ;;  %v447_v46 = vld [vmem:[#allocation3 + $0x6c] ss:$8 sm:$0x7]  ;;  %v826_v61 = vpop.permute.xlu0 %825  ;;  %v979_v43 = vsel %vm978_vm8, %v977_v37, %v1735_v24  ;;  %v878_v24 = vsel %vm877_vm9, %v876_v49, %v1771_v39  ;;  %v945_v39 = vrot.slane %v1784_v60, 7  ;;  %v482_v37 = vrot.slane %v1749_v32, 7 }
  0xcf   : > { %395 = vst.msk [vmem:[#allocation3 + $0x98] sm:$0xff] %vm378_vm3, %v366_v44  ;;  %v454_v48 = vmul.f32 %v452_v45, %v447_v46  ;;  %v840_v29 = vld [vmem:[#allocation3 + $0x69] ss:$8 sm:$0x7]  ;;  %v827_v10 = vrot.slane %v826_v61, 7  ;;  %vm510_vm8 = vcmask 384000  }
  0xd0   : > { %671 = vrot.lane.b32.xlu0 %v669_v42, %s1514_s6  ;;  %v564_v52 = vld [vmem:[#allocation3 + $0x6d] ss:$8 sm:$0x7]  ;;  %v847_v59 = vmul.f32 %v845_v54, %v840_v29  ;;  %v678_v31 = vld [vmem:[#allocation3 + $0x6e] ss:$8 sm:$0x7] }
  0xd1   : > { %456 = vrot.lane.b32.xlu2 %v454_v48, %s1524_s27  ;;  %v571_v63 = vmul.f32 %v569_v57, %v564_v52  ;;  %v685_v5 = vmul.f32 %v683_v1, %v678_v31  ;;  %v829_v15 = vsel %vm828_vm4, %v827_v10, %v826_v61  ;;  %v761_v36 = vld [vmem:[#allocation3 + $0x6f] ss:$8 sm:$0x7]  ;;  %v808_v42 = vld [vmem:[#allocation3 + $0x23] ss:$8 sm:$0x7] }
  0xd2   : > { %v293_v50 = vpop.f32.mrf.mxu1  ;;  %v831_v22 = vmul.f32 %v829_v15, %v824_v14  ;;  %v815_v48 = vmul.f32 %v813_v38, %v808_v42  ;;  %v1024_v52 = vld [vmem:[#allocation3 + $0x6] ss:$8 sm:$0x7]  ;;  %v1110_v54 = vrot.slane %v1741_v28, 7  ;;  %vm1095_vm4 = vcmask 154624  }
  0xd3   : > { %397 = vst [vmem:[#allocation3 + $0xa8] sm:$0xff] %v293_v50  ;;  %v515_v38 = vld [vmem:[#allocation3 + $0x20] ss:$8 sm:$0x7]  ;;  %vm411_vm9 = vcmask 629760  }
  0xd4   : > { %557 = vrot.lane.b32.xlu1 %v555_v47, %s1518_s10  ;;  %v1813_v44 = vpop.permute.xlu2 %516  ;;  %v1112_v61 = vsel %vm1111_vm11, %v1110_v54, %v1741_v28  ;;  %vm421_vm11 = vcmask 760832  }
  0xd5   : > { %v331_v55 = vpop.f32.mrf.mxu2  ;;  %v369_v56 = vpop.f32.mrf.mxu3 }
  0xd6   : > { %398 = vst [vmem:[#allocation3 + $0xb0] sm:$0xff] %v331_v55  ;;  %v694_v2 = vld [vmem:[#allocation3 + $0x8d] ss:$8 sm:$0x7]  ;;  %v1795_v13 = vpop.permute.xlu0 %890 }
  0xd7   : > { %399 = vst.msk [vmem:[#allocation3 + $0xb8] sm:$0xff] %vm378_vm3, %v369_v56  ;;  %v770_v8 = vld [vmem:[#allocation3 + $0x8e] ss:$8 sm:$0x7]  ;;  %v701_v9 = vmul.f32 %v699_v3, %v694_v2 }
  0xd8   : > { %736 = vrot.lane.b32.xlu0 %v734_v0, %s1498_s20  ;;  %v463_v19 = vld [vmem:[#allocation3 + $0x8b] ss:$8 sm:$0x7]  ;;  %v974_v34 = vld [vmem:[#allocation3 + $0x89] ss:$8 sm:$0x7] }
  0xd9   : > { %573 = vrot.lane.b32.xlu2 %v571_v63, %s1518_s10  ;;  %v470_v25 = vmul.f32 %v468_v18, %v463_v19  ;;  %v981_v46 = vmul.f32 %v979_v43, %v974_v34  ;;  %v873_v50 = vld [vmem:[#allocation3 + $0x8f] ss:$8 sm:$0x7]  ;;  %v947_v63 = vsel %vm946_vm13, %v945_v39, %v1784_v60  ;;  %vm860_vm13 = vcmask 138240  }
  0xda   : > { %v880_v57 = vmul.f32 %v878_v24, %v873_v50  ;;  %v949_v2 = vmul.f32 %v947_v63, %v942_v23  ;;  %v752_v24 = vld [vmem:[#allocation3 + $0x68] ss:$8 sm:$0x3] }
  0xdc   : > { %849 = vrot.lane.b32.xlu1 %v847_v59, %s1525_s28  ;;  %v1826_v55 = vpop.permute.xlu2 %581  ;;  %v599_v59 = vrot.slane %v1759_v58, 7 }
  0xde   : > { %v960_v21 = vpop.permute.xlu0 %959  ;;  %v779_v29 = vld [vmem:[#allocation3 + $0xad] ss:$8 sm:$0x7]  ;;  %v1107_v62 = vld [vmem:[#allocation3 + $0xa9] ss:$8 sm:$0x7]  ;;  %v601_v0 = vsel %vm600_vm14, %v599_v59, %v1759_v58 }
  0xdf   : > { %v961_v35 = vrot.slane %v960_v21, 7  ;;  %v596_v31 = vld [vmem:[#allocation3 + $0xab] ss:$8 sm:$0x7]  ;;  %v1114_v1 = vmul.f32 %v1112_v61, %v1107_v62  ;;  %vm527_vm14 = vcmask 908288  }
  0xe0   : > { %772 = vrot.lane.b32.xlu0 %v770_v8, %s1487_s5  ;;  %v603_v3 = vmul.f32 %v601_v0, %v596_v31  ;;  %v892_v8 = vrot.slane %v1795_v13, 7  ;;  %v1006_v60 = vld [vmem:[#allocation3 + $0xaf] ss:$8 sm:$0x7] }
  0xe1   : > { %703 = vrot.lane.b32.xlu2 %v701_v9, %s1514_s6  ;;  %v963_v40 = vsel %vm962_vm7, %v961_v35, %v960_v21  ;;  %v889_v10 = vld [vmem:[#allocation3 + $0xae] ss:$8 sm:$0x7]  ;;  %v1075_v21 = vld [vmem:[#allocation3 + $0x6b] ss:$8 sm:$0x7] }
  0xe2   : > { %v894_v58 = vsel %vm893_vm15, %v892_v8, %v1795_v13  ;;  %v1091_v13 = vld [vmem:[#allocation3 + $0x8a] ss:$8 sm:$0x7]  ;;  %v518_v35 = vrot.slane %v1813_v44, 7  ;;  %vm483_vm7 = vcmask 367616   ;;  %v440_v8 = vrot.slane %v1745_v30, 7 }
  0xe3   : > { %v896_v16 = vmul.f32 %v894_v58, %v889_v10  ;;  %v484_v43 = vsel %vm483_vm7, %v482_v37, %v1749_v32  ;;  %vm920_vm15 = vcmask 351232   ;;  %vm1070_vm7 = vcmask 736256  }
  0xe4   : > { %687 = vrot.lane.b32.xlu1 %v685_v5, %s1514_s6  ;;  %v1009_v5 = vrot.slane %v1793_v11, 7  ;;  %v1841_v9 = vpop.permute.xlu2 %648 }
  0xe6   : > { %v1027_v45 = vpop.permute.xlu0 %1026  ;;  %v1011_v28 = vsel %vm1010_vm2, %v1009_v5, %v1793_v11  ;;  %vm803_vm2 = vcmask 1014784  }
  0xe7   : > { %v1028_v41 = vrot.slane %v1027_v45, 7  ;;  %v1013_v15 = vmul.f32 %v1011_v28, %v1006_v60  ;;  %v420_v28 = vrot.slane %v1737_v26, 7  ;;  %v417_v60 = vld [vmem:[#allocation3 + $0x7] ss:$8 sm:$0x7] }
  0xe8   : > { %833 = vrot.lane.b32.xlu0 %v831_v22, %s1525_s28  ;;  %v1078_v22 = vrot.slane %v1804_v20, 7 }
  0xe9   : > { %727 = vrot.lane.b32.xlu2 %v725_v17, %s1498_s20  ;;  %s1528_s20 = smov 107   ;;  %v1030_v12 = vsel %vm1029_vm10, %v1028_v41, %v1027_v45  ;;  %v410_v41 = vrot.slane %v1739_v27, 7  ;;  %vm441_vm10 = vcmask 1022976  }
  0xea   : > { %v1032_v56 = vmul.f32 %v1030_v12, %v1024_v52  ;;  %v1080_v11 = vsel %vm1079_vm0, %v1078_v22, %v1804_v20  ;;  %v479_v20 = vld [vmem:[#allocation3 + $0xaa] ss:$8 sm:$0x7]  ;;  %vm1037_vm0 = vcmask 211968  }
  0xeb   : > { %v1082_v33 = vmul.f32 %v1080_v11, %v1075_v21  ;;  %v486_v45 = vmul.f32 %v484_v43, %v479_v20  ;;  %v412_v12 = vsel %vm411_vm9, %v410_v41, %v1739_v27 }
  0xec   : > { %792 = vrot.lane.b32.xlu1 %v1629_v4, %s1526_s29  ;;  %v712_v18 = vpop.permute.xlu2 %711  ;;  %s1532_s29 = smov 34  }
  0xee   : > { %v1093_v14 = vpop.permute.xlu0 %1092 }
  0xef   : > { %v1094_v17 = vrot.slane %v1093_v14, 7 }
  0xf0   : > { %472 = vrot.lane.b32.xlu0 %v470_v25, %s1524_s27 }
  0xf1   : > { %763 = vrot.lane.b32.xlu2 %v761_v36, %s1487_s5  ;;  %v1096_v19 = vsel %vm1095_vm4, %v1094_v17, %v1093_v14  ;;  %v583_v36 = vrot.slane %v1826_v55, 7  ;;  %v442_v14 = vsel %vm441_vm10, %v440_v8, %v1745_v30  ;;  %vm937_vm4 = vcmask 875520  }
  0xf2   : > { %v1098_v25 = vmul.f32 %v1096_v19, %v1091_v13  ;;  %vm403_vm10 = vcmask 516096  }
  0xf3   : > { %v585_v42 = vsel %vm584_vm6, %v583_v36, %v1826_v55 }
  0xf4   : > { %857 = vrot.lane.b32.xlu1 %v1629_v4, %s1527_s30  ;;  %v958_v4 = vld [vmem:[#allocation3 + $0x6a] ss:$8 sm:$0x7]  ;;  %s1533_s30 = smov 115  }
  0xf5   : > { %v965_v47 = vmul.f32 %v963_v40, %v958_v4  ;;  %v520_v40 = vsel %vm519_vm5, %v518_v35, %v1813_v44  ;;  %v710_v44 = vld [vmem:[#allocation3 + $0xac] ss:$8 sm:$0x7] }
  0xf6   : > { %v522_v4 = vmul.f32 %v520_v40, %v515_v38 }
  0xf8   : > { %967 = vrot.lane.b32.xlu0 %v965_v47, %s1528_s20  ;;  %v713_v47 = vrot.slane %v712_v18, 7 }
  0xf9   : > { %817 = vrot.lane.b32.xlu2 %v815_v48, %s1525_s28 }
  0xfa   : > { %v714_v49 = vsel %vm510_vm8, %v713_v47, %v712_v18  ;;  %v422_v18 = vsel %vm421_vm11, %v420_v28, %v1737_v26  ;;  %vm929_vm11 = vcmask 801792  }
  0xfb   : > { %v716_v32 = vmul.f32 %v714_v49, %v710_v44  ;;  %v424_v21 = vmul.f32 %v422_v18, %v417_v60 }
  0xfc   : > { %983 = vrot.lane.b32.xlu1 %v981_v46, %s1528_s20 }
 0x100   : > { %1034 = vrot.lane.b32.xlu0 %v1032_v56, %s1523_s26 }
 0x101   : > { %882 = vrot.lane.b32.xlu2 %v880_v57, %s1529_s9 }
 0x104   : > { %781 = vrot.lane.b32.xlu1 %v779_v29, %s1487_s5  ;;  %v406_v29 = vld [vmem:[#allocation3] ss:$8 sm:$0x7] }
 0x105   : > { %v414_v54 = vmul.f32 %v412_v12, %v406_v29 }
 0x108   : > { %605 = vrot.lane.b32.xlu0 %v603_v3, %s1520_s17 }
 0x109   : > { %951 = vrot.lane.b32.xlu2 %v949_v2, %s1528_s20 }
 0x10c   : > { %1116 = vrot.lane.b32.xlu1 %v1114_v1, %s1530_s11 }
 0x110   : > { %898 = vrot.lane.b32.xlu0 %v896_v16, %s1529_s9 }
 0x111   : > { %1015 = vrot.lane.b32.xlu2 %v1013_v15, %s1522_s25  ;;  %v437_v15 = vld [vmem:[#allocation3 + $0x45] ss:$8 sm:$0x7] }
 0x112   : > { %v1856_v34 = vpop.permute.xlu2 %507  ;;  %v444_v35 = vmul.f32 %v442_v14, %v437_v15 }
 0x113   : > { %v509_v58 = vrot.slane %v1856_v34, 7 }
 0x114   : > { %926 = vrot.lane.b32.xlu1 %v1643_v6, %s1531_s24 }
 0x115   : > { %v511_v19 = vsel %vm510_vm8, %v509_v58, %v1856_v34 }
 0x116   : > { %v513_v40 = vadd.f32 %v511_v19, %v444_v35 }
 0x118   : > { %1100 = vrot.lane.b32.xlu0 %v1098_v25, %s1530_s11  ;;  %v856_v25 = vld [vmem:[#allocation3 + $0x88] ss:$8 sm:$0x7] }
 0x119   : > { %1084 = vrot.lane.b32.xlu2 %v1082_v33, %s1530_s11 }
 0x11a   : > { %v1868_v48 = vpop.permute.xlu2 %640 }
 0x11b   : > { %v642_v34 = vrot.slane %v1868_v48, 7 }
 0x11c   : > { %991 = vrot.lane.b32.xlu1 %v1643_v6, %s1532_s29  ;;  %v580_v6 = vld [vmem:[#allocation3 + $0x8c] ss:$8 sm:$0x7]  ;;  %s1441_s29 = scalar_lea.hbm %s2057_s3, 16 }
 0x11d   : > { %v587_v46 = vmul.f32 %v585_v42, %v580_v6 }
 0x120   : > { %589 = vrot.lane.b32.xlu0 %v587_v46, %s1520_s17  ;;  %v643_v46 = vsel %vm584_vm6, %v642_v34, %v1868_v48  ;;  %v647_v34 = vld [vmem:[#allocation3 + $0x40] ss:$8 sm:$0x7] }
 0x121   : > { %524 = vrot.lane.b32.xlu2 %v522_v4, %s1518_s10  ;;  %s1534_s10 = smov 51  }
 0x124   : > { %488 = vrot.lane.b32.xlu1 %v486_v45, %s1524_s27 }
 0x128   : > { %754 = vrot.lane.b32.xlu0 %v752_v24, %s1487_s5  ;;  %s1535_s5 = smov 112  }
 0x129   : > { %718 = vrot.lane.b32.xlu2 %v716_v32, %s1516_s8  ;;  %s161_s8 = sand.u32 1, %s1475_s13  }
 0x12a   : > { %v1877_v50 = vpop.permute.xlu1 %917  ;;  %s1278_s17 = sshll.u32 %s161_s8, 3 }
 0x12b   : > { %v457_v51 = vpop.permute.xlu2 %456 }
 0x12c   : > { %1059 = vrot.lane.b32.xlu1 %v1648_v7, %s1533_s30  ;;  %v458_v52 = vrot.slane %v457_v51, 7 }
 0x12e   : > { %v459_v55 = vsel %vm378_vm3, %v458_v52, %v457_v51 }
 0x12f   : > { %v1880_v56 = vadd.f32 %v459_v55, %v414_v54  ;;  %v919_v55 = vrot.slane %v1877_v50, 7 }
 0x132   : > { %v542_v39 = vpop.permute.xlu0 %541 }
 0x133   : > { %v574_v63 = vpop.permute.xlu2 %573  ;;  %v543_v11 = vrot.slane %v542_v39, 1 }
 0x134   : > { %1124 = vrot.lane.b32.xlu1 %v1648_v7, %s1534_s10  ;;  %v575_v16 = vrot.slane %v574_v63, 7 }
 0x135   : > { %v544_v26 = vsel %vm527_vm14, %v542_v39, %v543_v11 }
 0x136   : > { %v1884_v57 = vpop.permute.xlu1 %624  ;;  %v576_v20 = vsel %vm527_vm14, %v575_v16, %v574_v63 }
 0x137   : > { %v578_v43 = vadd.f32 %v576_v20, %v513_v40 }
 0x139   : > { %v645_v49 = vadd.f32 %v643_v46, %v578_v43 }
 0x13a   : > { %v746_v27 = vpop.permute.xlu0 %745 }
 0x13b   : > { %v704_v31 = vpop.permute.xlu2 %703  ;;  %v747_v44 = vrot.slane %v746_v27, 7 }
 0x13c   : > { %v705_v42 = vrot.slane %v704_v31, 7 }
 0x13d   : > { %v748_v24 = vsel %vm451_vm12, %v747_v44, %v746_v27  ;;  %v921_v27 = vsel %vm920_vm15, %v919_v55, %v1877_v50 }
 0x13e   : > { %v1886_v59 = vpop.permute.xlu1 %1051  ;;  %v706_v47 = vsel %vm519_vm5, %v705_v42, %v704_v31 }
 0x13f   : > { %v708_v41 = vadd.f32 %v706_v47, %v645_v49  ;;  %v1053_v28 = vrot.slane %v1886_v59, 7 }
 0x141   : > { %v750_v54 = vadd.f32 %v748_v24, %v708_v41 }
 0x142   : > { %v1890_v62 = vpop.permute.xlu0 %671 }
 0x143   : > { %v1902_v5 = vpop.permute.xlu2 %727  ;;  %v673_v11 = vrot.slane %v1890_v62, 1 }
 0x145   : > { %v674_v20 = vsel %vm519_vm5, %v1890_v62, %v673_v11  ;;  %v990_v11 = vld [vmem:[#allocation3 + $0xa8] ss:$8 sm:$0x7] }
 0x146   : > { %v1888_v61 = vpop.permute.xlu1 %557 }
 0x14a   : > { %v1892_v23 = vpop.permute.xlu0 %736 }
 0x14b   : > { %v1911_v36 = vpop.permute.xlu2 %763 }
 0x14c   : > { %v765_v47 = vrot.slane %v1911_v36, 7 }
 0x14d   : > { %v334_v35 = vpop.f32.mrf.mxu2 }
 0x14e   : > { %v850_v0 = vpop.permute.xlu1 %849  ;;  %402 = vst [vmem:[#allocation3 + $0xd0] sm:$0x1] %v334_v35 }
 0x14f   : > { %v851_v29 = vrot.slane %v850_v0, 7 }
 0x151   : > { %v852_v63 = vsel %vm803_vm2, %v851_v29, %v850_v0  ;;  %v1054_v0 = vsel %vm1037_vm0, %v1053_v28, %v1886_v59  ;;  %v729_v59 = vrot.slane %v1902_v5, 7 }
 0x152   : > { %v1896_v2 = vpop.permute.xlu0 %772 }
 0x153   : > { %v1923_v32 = vpop.permute.xlu2 %817  ;;  %v730_v46 = vsel %vm451_vm12, %v729_v59, %v1902_v5  ;;  %v430_v5 = vrot.slane %v1755_v53, 7  ;;  %v774_v35 = vrot.slane %v1896_v2, 7 }
 0x154   : > { %v819_v24 = vrot.slane %v1923_v32, 1 }
 0x156   : > { %v1894_v1 = vpop.permute.xlu1 %687 }
 0x15a   : > { %v1900_v3 = vpop.permute.xlu0 %833 }
 0x15b   : > { %v1934_v58 = vpop.permute.xlu2 %882 }
 0x15c   : > { %v884_v55 = vrot.slane %v1934_v58, 7 }
 0x15e   : > { %v1898_v7 = vpop.permute.xlu1 %792 }
 0x15f   : > { %v794_v62 = vrot.slane %v1898_v7, 7 }
 0x162   : > { %v473_v22 = vpop.permute.xlu0 %472 }
 0x163   : > { %v474_v13 = vrot.slane %v473_v22, 7  ;;  %v952_v40 = vpop.permute.xlu2 %951 }
 0x165   : > { %v475_v30 = vsel %vm378_vm3, %v474_v13, %v473_v22 }
 0x166   : > { %v858_v10 = vpop.permute.xlu1 %857  ;;  %v477_v38 = vadd.f32 %v475_v30, %v424_v21  ;;  %v372_v30 = vpop.f32.mrf.mxu3 }
 0x167   : > { %v859_v17 = vrot.slane %v858_v10, 7  ;;  %404 = vst.msk [vmem:[#allocation3 + $0xd8] sm:$0x1] %vm403_vm10, %v372_v30  ;;  %vm431_vm10 = vcmask 891904  }
 0x168   : > { %v546_v6 = vadd.f32 %v544_v26, %v477_v38 }
 0x169   : > { %v861_v33 = vsel %vm860_vm13, %v859_v17, %v858_v10  ;;  %vm795_vm13 = vcmask 662528  }
 0x16a   : > { %v863_v37 = vmul.f32 %v861_v33, %v856_v25  ;;  %v1918_v4 = vpop.permute.xlu0 %967  ;;  %v296_v25 = vpop.f32.mrf.mxu1  ;;  %v650_v33 = vrot.slane %v1841_v9, 7  ;;  %v796_v29 = vsel %vm795_vm13, %v794_v62, %v1898_v7  ;;  %v559_v7 = vrot.slane %v1888_v61, 1 }
 0x16b   : > { %401 = vst [vmem:[#allocation3 + $0xc8] sm:$0x1] %v296_v25 }
 0x16c   : > { %865 = vrot.lane.b32.xlu2 %v863_v37, %s1529_s9  ;;  %v651_v42 = vsel %vm527_vm14, %v650_v33, %v1841_v9  ;;  %v766_v9 = vsel %vm411_vm9, %v765_v47, %v1911_v36  ;;  %v432_v36 = vsel %vm431_vm10, %v430_v5, %v1755_v53  ;;  %v738_v33 = vrot.slane %v1892_v23, 7 }
 0x16d   : > { %v653_v44 = vmul.f32 %v651_v42, %v647_v34  ;;  %v835_v42 = vrot.slane %v1900_v3, 1  ;;  %v775_v47 = vsel %vm411_vm9, %v774_v35, %v1896_v2 }
 0x16e   : > { %v984_v45 = vpop.permute.xlu1 %983 }
 0x16f   : > { %v985_v31 = vrot.slane %v984_v45, 7 }
 0x171   : > { %v986_v14 = vsel %vm937_vm4, %v985_v31, %v984_v45 }
 0x172   : > { %v1926_v51 = vpop.permute.xlu0 %1034  ;;  %v1123_v5 = vld [vmem:[#allocation3 + $0xc8] ss:$8 sm:$0x7] }
 0x176   : > { %v782_v12 = vpop.permute.xlu1 %781 }
 0x177   : > { %v783_v52 = vrot.slane %v782_v12, 7 }
 0x179   : > { %v784_v48 = vsel %vm411_vm9, %v783_v52, %v782_v12  ;;  %v1016_v52 = vpop.permute.xlu2 %1015 }
 0x17a   : > { %v786_v39 = vadd.f32 %v784_v48, %v750_v54  ;;  %v606_v15 = vpop.permute.xlu0 %605  ;;  %v820_v54 = vsel %vm803_vm2, %v1923_v32, %v819_v24  ;;  %v790_v48 = vld [vmem:[#allocation3 + $0x4] ss:$8 sm:$0x7]  ;;  %v953_v32 = vrot.slane %v952_v40, 1 }
 0x17b   : > { %v607_v22 = vrot.slane %v606_v15, 7 }
 0x17c   : > { %v854_v8 = vadd.f32 %v852_v63, %v786_v39  ;;  %v798_v39 = vmul.f32 %v796_v29, %v790_v48 }
 0x17d   : > { %v608_v50 = vsel %vm510_vm8, %v607_v22, %v606_v15  ;;  %v626_v15 = vrot.slane %v1884_v57, 7 }
 0x17e   : > { %v923_v60 = vadd.f32 %v921_v27, %v854_v8  ;;  %v1117_v10 = vpop.permute.xlu1 %1116  ;;  %v610_v19 = vadd.f32 %v608_v50, %v546_v6  ;;  %v925_v6 = vld [vmem:[#allocation3 + $0x24] ss:$8 sm:$0x7]  ;;  %v427_v8 = vld [vmem:[#allocation3 + $0x26] ss:$8 sm:$0x7]  ;;  %v954_v50 = vsel %vm937_vm4, %v952_v40, %v953_v32 }
 0x17f   : > { %v1118_v16 = vrot.slane %v1117_v10, 7  ;;  %v627_v25 = vsel %vm584_vm6, %v626_v15, %v1884_v57  ;;  %v739_v57 = vsel %vm451_vm12, %v738_v33, %v1892_v23  ;;  %v969_v23 = vrot.slane %v1918_v4, 7 }
 0x180   : > { %v988_v17 = vadd.f32 %v986_v14, %v923_v60  ;;  %v676_v26 = vadd.f32 %v674_v20, %v610_v19  ;;  %vm1142_vm12 = vcmask 916480  }
 0x181   : > { %v1119_v13 = vsel %vm1070_vm7, %v1118_v16, %v1117_v10  ;;  %v434_v10 = vmul.f32 %v432_v36, %v427_v8 }
 0x182   : > { %v1056_v18 = vadd.f32 %v1054_v0, %v988_v17  ;;  %v732_v49 = vadd.f32 %v730_v46, %v676_v26  ;;  %v560_v17 = vsel %vm527_vm14, %v1888_v61, %v559_v7  ;;  %v689_v0 = vrot.slane %v1894_v1, 7  ;;  %v899_v40 = vpop.permute.xlu0 %898 }
 0x184   : > { %v1121_v21 = vadd.f32 %v1119_v13, %v1056_v18  ;;  %v768_v12 = vadd.f32 %v766_v9, %v732_v49  ;;  %v1017_v18 = vrot.slane %v1016_v52, 7 }
 0x186   : > { %v927_v37 = vpop.permute.xlu1 %926  ;;  %1147 = vrot.lane.b32.xlu1 %v1121_v21, %s1535_s5  ;;  %v822_v63 = vadd.f32 %v820_v54, %v768_v12  ;;  %v1018_v59 = vsel %vm920_vm15, %v1017_v18, %v1016_v52  ;;  %v1036_v12 = vrot.slane %v1926_v51, 7  ;;  %v970_v54 = vsel %vm937_vm4, %v969_v23, %v1918_v4 }
 0x187   : > { %v928_v38 = vrot.slane %v927_v37, 7 }
 0x189   : > { %v930_v43 = vsel %vm929_vm11, %v928_v38, %v927_v37  ;;  %vm868_vm11 = vcmask 490496   ;;  %v690_v37 = vsel %vm519_vm5, %v689_v0, %v1894_v1 }
 0x18a   : > { %v932_v45 = vmul.f32 %v930_v43, %v925_v6  ;;  %v885_v28 = vsel %vm868_vm11, %v884_v55, %v1934_v58  ;;  %v1085_v58 = vpop.permute.xlu2 %1084  ;;  %v1058_v6 = vld [vmem:[#allocation3 + $0x44] ss:$8 sm:$0x7]  ;;  %v1101_v36 = vpop.permute.xlu0 %1100 }
 0x18b   : > { %v887_v14 = vadd.f32 %v885_v28, %v822_v63  ;;  %v1086_v20 = vrot.slane %v1085_v58, 7 }
 0x18c   : > { %934 = vrot.lane.b32.xlu0 %v932_v45, %s1528_s20  ;;  %s163_s20 = scalar_lea.vmem [#allocation4], %s1278_s17 }
 0x18d   : > { %v956_v21 = vadd.f32 %v954_v50, %v887_v14  ;;  %v1087_v1 = vsel %vm1070_vm7, %v1086_v20, %v1085_v58  ;;  %s1212_s4 = sshll.u32 %s163_s20, 4  ;;  %s1213_s4 = int_to_ptr.vmem [resolvable:$true] %s1212_s4 }
 0x18e   : > { %v992_v41 = vpop.permute.xlu1 %991  ;;  %655 = vrot.lane.b32.xlu1 %v653_v44, %s1514_s6  ;;  %v900_v44 = vrot.slane %v899_v40, 7  ;;  %s1536_s6 = smov 96  }
 0x18f   : > { %v993_v31 = vrot.slane %v992_v41, 7  ;;  %v1020_v34 = vadd.f32 %v1018_v59, %v956_v21 }
 0x190   : > { %v901_v2 = vsel %vm868_vm11, %v900_v44, %v899_v40 }
 0x191   : > { %v995_v16 = vsel %vm994_vm1, %v993_v31, %v992_v41  ;;  %vm1062_vm1 = vcmask 941056   ;;  %v1089_v62 = vadd.f32 %v1087_v1, %v1020_v34  ;;  %v836_v41 = vsel %vm803_vm2, %v1900_v3, %v835_v42 }
 0x192   : > { %v997_v13 = vmul.f32 %v995_v16, %v990_v11  ;;  %v1102_v31 = vrot.slane %v1101_v36, 7  ;;  %v525_v28 = vpop.permute.xlu2 %524 }
 0x193   : > { %v526_v14 = vrot.slane %v525_v28, 1 }
 0x195   : > { %v528_v16 = vsel %vm527_vm14, %v525_v28, %v526_v14 }
 0x196   : > { %v489_v27 = vpop.permute.xlu1 %488  ;;  %800 = vrot.lane.b32.xlu1 %v798_v39, %s1525_s28  ;;  %v1038_v39 = vsel %vm1037_vm0, %v1036_v12, %v1926_v51 }
 0x197   : > { %v490_v60 = vrot.slane %v489_v27, 7 }
 0x199   : > { %v491_v53 = vsel %vm378_vm3, %v490_v60, %v489_v27  ;;  %vm1127_vm3 = vcmask 416768   ;;  %v1103_v27 = vsel %vm1070_vm7, %v1102_v31, %v1101_v36  ;;  %v590_v60 = vpop.permute.xlu0 %589 }
 0x19a   : > { %v493_v22 = vadd.f32 %v491_v53, %v434_v10  ;;  %v591_v51 = vrot.slane %v590_v60, 7  ;;  %v719_v0 = vpop.permute.xlu2 %718 }
 0x19b   : > { %v720_v11 = vrot.slane %v719_v0, 7 }
 0x19c   : > { %v562_v19 = vadd.f32 %v560_v17, %v493_v22  ;;  %v592_v22 = vsel %vm510_vm8, %v591_v51, %v590_v60  ;;  %v530_v17 = vadd.f32 %v528_v16, %v1880_v56 }
 0x19d   : > { %v721_v21 = vsel %vm584_vm6, %v720_v11, %v719_v0 }
 0x19e   : > { %v629_v30 = vadd.f32 %v627_v25, %v562_v19  ;;  %v1060_v61 = vpop.permute.xlu1 %1059  ;;  %999 = vrot.lane.b32.xlu1 %v997_v13, %s1522_s25  ;;  %v594_v18 = vadd.f32 %v592_v22, %v530_v17  ;;  %s1325_s25 = sshll.u32 %s1578_s16, 3  ;;  %s1199_s16 = scalar_lea.sflag [#allocation5], %s161_s8 }
 0x19f   : > { %v1061_v38 = vrot.slane %v1060_v61, 7  ;;  %s1210_s28 = scalar_lea.hbm %s2057_s3, %s1325_s25 }
 0x1a0   : > { %v692_v26 = vadd.f32 %v690_v37, %v629_v30  ;;  %s1214_s7 = sshll.u32 %s1210_s28, 4  ;;  %s1215_s7 = int_to_ptr.hbm [resolvable:$true] %s1214_s7 }
 0x1a1   : > { %v1063_v43 = vsel %vm1062_vm1, %v1061_v38, %v1060_v61  ;;  %v755_v58 = vpop.permute.xlu0 %754  ;;  %s1435_s9 = sshra.s32 %s1215_s7, 4  ;;  %s1436_s9 = int_to_ptr.hbm [resolvable:$true] %s1435_s9 }
 0x1a2   : > { %v741_v45 = vadd.f32 %v739_v57, %v692_v26  ;;  %v1065_v46 = vmul.f32 %v1063_v43, %v1058_v6  ;;  %v756_v25 = vrot.slane %v755_v58, 7  ;;  %p1442_p0 = scmp.lt.s32.totalorder %s1436_s9, %s2057_s3 }
 0x1a4   : > { %v777_v49 = vadd.f32 %v775_v47, %v741_v45  ;;  %1067 = vrot.lane.b32.xlu2 %v1065_v46, %s1530_s11  ;;  %v757_v61 = vsel %vm411_vm9, %v756_v25, %v755_v58  ;;  %s1437_s11 = scalar_lea.hbm %s1436_s9, 8 }
 0x1a5   : > { %p1438_p11 = scmp.ne.s32.totalorder %s1436_s9, %s1437_s11  ;;  %p1443_p1 = scmp.lt.s32.totalorder %s1441_s29, %s1437_s11 }
 0x1a6   : > { %v1125_v9 = vpop.permute.xlu1 %1124  ;;  %1139 = vrot.lane.b32.xlu1 %v1089_v62, %s1535_s5  ;;  %v838_v24 = vadd.f32 %v836_v41, %v777_v49 }
 0x1a7   : > { %v1126_v29 = vrot.slane %v1125_v9, 7  ;;  %p1439_p12 = pnand %p1438_p11, %p1595_p5  ;;  %p1444_p2 = por %p1443_p1, %p1442_p0 }
 0x1a8   : > { %v903_v52 = vadd.f32 %v901_v2, %v838_v24 }
 0x1a9   : > { %v1128_v55 = vsel %vm1127_vm3, %v1126_v29, %v1125_v9  ;;  %p1440_p13 = pneg %p1439_p12 }
 0x1aa   : > { %v1130_v3 = vmul.f32 %v1128_v55, %v1123_v5  ;;  %v972_v48 = vadd.f32 %v970_v54, %v903_v52 }
 0x1ab   : > { %p1445_p3 = pnand %p1444_p2, %p1440_p13 }
 0x1ac   : > { %1132 = vrot.lane.b32.xlu0 %v1130_v3, %s1523_s26  ;;  %v1040_v63 = vadd.f32 %v1038_v39, %v972_v48  ;;  %v249_v48 = vpop.f32.mrf.mxu0 }
 0x1ae   : > { %v1105_v32 = vadd.f32 %v1103_v27, %v1040_v63 }
 0x1b4   : > { %v252_v36 = vpop.f32.mrf.mxu0 }
 0x1bc   : > { %v255_v17 = vpop.f32.mrf.mxu0 }
 0x1c4   : > { %v258_v0 = vpop.f32.mrf.mxu0 }
 0x1c6   : > { %v866_v30 = vpop.permute.xlu2 %865 }
 0x1c7   : > { %v867_v56 = vrot.slane %v866_v30, 7 }
 0x1c9   : > { %v869_v26 = vsel %vm868_vm11, %v867_v56, %v866_v30 }
 0x1f8   : > { %v1148_v8 = vpop.permute.xlu1 %1147 }
 0x1f9   : > { %v1149_v7 = vrot.slane %v1148_v8, 1 }
 0x1fb   : > { %v1150_v4 = vsel %vm1142_vm12, %v1148_v8, %v1149_v7 }
 0x1fc   : > { %v1152_v10 = vadd.f32 %v1150_v4, %v1105_v32 }
 0x1fe   : > { %1154 = vrot.lane.b32.xlu2 %v1152_v10, %s1536_s6  ;;  %v935_v20 = vpop.permute.xlu0 %934  ;;  %v1068_v6 = vpop.permute.xlu2 %1067 }
 0x1ff   : > { %v936_v34 = vrot.slane %v935_v20, 1  ;;  %v1069_v47 = vrot.slane %v1068_v6, 1 }
 0x200   : > { %v656_v15 = vpop.permute.xlu1 %655 }
 0x201   : > { %v657_v53 = vrot.slane %v656_v15, 1  ;;  %v938_v43 = vsel %vm937_vm4, %v935_v20, %v936_v34  ;;  %v1071_v62 = vsel %vm1070_vm7, %v1068_v6, %v1069_v47 }
 0x203   : > { %v658_v50 = vsel %vm519_vm5, %v656_v15, %v657_v53  ;;  %vm1157_vm5 = vcmask 785408  }
 0x204   : > { %v660_v13 = vadd.f32 %v658_v50, %v594_v18 }
 0x206   : > { %v723_v35 = vadd.f32 %v721_v21, %v660_v13  ;;  %v1180_v13 = vld [vmem:[%s1635_s19] sm:$0xff] }
 0x208   : > { %v801_v19 = vpop.permute.xlu1 %800  ;;  %v759_v59 = vadd.f32 %v757_v61, %v723_v35 }
 0x209   : > { %v802_v33 = vrot.slane %v801_v19, 1 }
 0x20b   : > { %v804_v37 = vsel %vm803_vm2, %v801_v19, %v802_v33  ;;  %vm2061_vm2 = vcmask 1043456  }
 0x20c   : > { %v806_v38 = vadd.f32 %v804_v37, %v759_v59 }
 0x20e   : > { %v871_v42 = vadd.f32 %v869_v26, %v806_v38 }
 0x210   : > { %v1000_v40 = vpop.permute.xlu1 %999  ;;  %v940_v46 = vadd.f32 %v938_v43, %v871_v42 }
 0x211   : > { %v1001_v57 = vrot.slane %v1000_v40, 7 }
 0x213   : > { %v1002_v45 = vsel %vm920_vm15, %v1001_v57, %v1000_v40  ;;  %vm2062_vm15 = vmmov %vm2061_vm2 }
 0x214   : > { %v1004_v1 = vadd.f32 %v1002_v45, %v940_v46 }
 0x216   : > { %v1073_v9 = vadd.f32 %v1071_v62, %v1004_v1 }
 0x218   : > { %v1140_v44 = vpop.permute.xlu1 %1139 }
 0x219   : > { %v1141_v41 = vrot.slane %v1140_v44, 1 }
 0x21b   : > { %v1143_v2 = vsel %vm1142_vm12, %v1140_v44, %v1141_v41 }
 0x21e   : > { %v1133_v49 = vpop.permute.xlu0 %1132 }
 0x21f   : > { %v1134_v23 = vrot.slane %v1133_v49, 7 }
 0x221   : > { %v1135_v24 = vsel %vm1037_vm0, %v1134_v23, %v1133_v49 }
 0x222   : > { %v1137_v12 = vadd.f32 %v1135_v24, %v1073_v9 }
 0x224   : > { %v1145_v5 = vadd.f32 %v1143_v2, %v1137_v12 }
 0x258   : > { %v1155_v29 = vpop.permute.xlu2 %1154 }
 0x259   : > { %v1156_v52 = vrot.slane %v1155_v29, 1 }
 0x25b   : > { %v1158_v54 = vsel %vm1157_vm5, %v1155_v29, %v1156_v52 }
 0x25c   : > { %v1160_v55 = vadd.f32 %v1158_v54, %v1145_v5 }
 0x25e   : > { %v1318_v3 = vmul.f32 -1.442695, %v1160_v55 }
 0x260   : > { %1417 = vpow2.f32 %v1318_v3 }
 0x266   : > { %v1418_v39 = vpop.eup %1417 }
 0x267   : > { %v1164_v63 = vadd.f32 1.0, %v1418_v39 }
 0x269   : > { %1419 = vrcp.f32 %v1164_v63  ;;  %v1176_v7 = vand.u32 2147483648, %v1164_v63  ;;  %v1174_v32 = vand.u32 2147483647, %v1164_v63  ;;  %vm1170_vm8 = vweird.f32 %v1164_v63 }
 0x26b   : > { %v1177_v60 = vor.u32 1.1754944e-38, %v1176_v7  ;;  %vm1175_vm14 = vcmp.eq.f32.partialorder %v1174_v32, 8.507059e+37 }
 0x26f   : > { %v1420_v31 = vpop.eup %1419 }
 0x270   : > { %v1166_v8 = vmul.f32 %v1420_v31, %v1164_v63  ;;  %vm1171_vm6 = vweird.f32 %v1420_v31 }
 0x271   : > { %vm1172_vm9 = vmor %vm1170_vm8, %vm1171_vm6 }
 0x272   : > { %v1167_v27 = vsub.f32 1.0, %v1166_v8 }
 0x274   : > { %v1168_v28 = vmul.f32 %v1420_v31, %v1167_v27 }
 0x276   : > { %v1169_v4 = vadd.f32 %v1420_v31, %v1168_v28 }
 0x278   : > { %v1173_v10 = vsel %vm1172_vm9, %v1420_v31, %v1169_v4 }
 0x279   : > { %v1178_v14 = vsel %vm1175_vm14, %v1177_v60, %v1173_v10 }
 0x27a   : > { %v1184_v51 = vperm.slane %v1178_v14, 2  ;;  %v1183_v15 = vperm.slane %v1178_v14, 1  ;;  %v1182_v16 = vperm.slane %v1178_v14, 0 }
 0x27c   : > { %1189 = vrot.lane.b32.xlu1 %v1184_v51, %s1534_s10  ;;  %v1185_v53 = vrot.slane %v1183_v15, 4 }
 0x27e   : > { %v1186_v22 = vsel %vm2061_vm2, %v1182_v16, %v1185_v53 }
 0x27f   : > { %1187 = vrot.lane.b32.xlu0 %v1186_v22, %s1534_s10 }
 0x2ee   : > { %v1190_v50 = vpop.permute.xlu1 %1189 }
 0x2ef   : > { %v1192_v11 = vrot.slane %v1190_v50, 4 }
 0x2f1   : > { %v1188_v18 = vpop.permute.xlu0 %1187 }
 0x2f2   : > { %v1191_v58 = vrot.slane %v1188_v18, 4 }
 0x2f4   : > { %v1193_v19 = vsel %vm2062_vm15, %v1191_v58, %v1192_v11 }
 0x2f5   : > { %v1194_v21 = vsel %vm1127_vm3, %v1188_v18, %v1193_v19 }
 0x2f6   : > { %v1196_v25 = vmul.f32 %v1194_v21, %v1180_v13 }
 0x2f8   : > { %1197 = vst [vmem:[%s163_s20] sm:$0xff] %v1196_v25 }
 0x2f9   : > { %1448 = shalt.err (!%p1445_p3)
}
 0x2fa   : > { %1326 = dma.vmem_to_hbm [thread:$0]  (%p1595_p5), %s1213_s4, 128, %s1215_s7, %s1199_s16  }
 0x2fb PF: > { %p1332_p4 = scmp.ge.s32.totalorder %s1483_s15, 2  ;;  %s1226_s5 = sand.u32 1, %s1471_s12  }
 0x2fc   : > { %s1227_s6 = scalar_lea.sflag [#allocation5], %s1226_s5 }
 0x2fd   : > { %p1329_p7 = pnand %p1332_p4, %p1599_p6 }
 0x2ff   : > { %p1330_p8 = pneg %p1329_p7 }
 0x301   : > { %1466 = dma.done.wait (%p1330_p8), %s1227_s6, 128  }
 0x302   : > { %1468 = vsyncadd (%p1330_p8), %s1227_s6, 4294967168  ;;  %p13_p9 = scmp.ge.s32.totalorder %s1582_s18, 4   ;;  %s2063_s12 = smov %s1475_s13 }
 0x303   : > { %s2064_s13 = smov %s1479_s14  ;;  %s2065_s14 = smov %s1593_s21 }
 0x304   : > { %s2066_s15 = smov %s1582_s18  ;;  %15 = sbr.rel (!%p13_p9) target bundleno = 3 (0x3), region = 121 }
 0x309   :  { %1233 = vsyncpa [#allocation5], 1 }
 0x30a   :  { %1235 = vsyncpa [#allocation5 + $0x1], 1 }

</bundles_post_ra>
